<compile_context>
chip_gen: v7x
topology: tpu7x:2x2x1
jax: 0.10.0
libtpu: 0.0.40
codegen_flags: <defaults>
</compile_context>

<pallas_src>
import numpy as np

import jax
import jax.numpy as jnp
from jax.experimental import pallas as pl
from jax.experimental.pallas import tpu as pltpu

C1P = 8     # conv1 out-channels padded 6 -> 8 (channel group size for conv2 input)
C2P = 16    # conv2 out-channels (already 16, no padding needed)
FCP = 128   # FC lane padding (lane-dense outputs)


# ------------------------------ Pallas kernels ------------------------------

def _conv_relu_pool_kernel(x_ref, we_ref, wo_ref, b_ref, se_ref, so_ref, o_ref):
    """Fused valid-conv + bias + ReLU + 2x2 max-pool for one image.

    x_ref : (1, H, W*Cin)       image, channels innermost along lanes
    we_ref: (KH, W*Cin, Wp*Cp)  Toeplitz weights -> conv output at even columns
    wo_ref: (KH, W*Cin, Wp*Cp)  Toeplitz weights -> conv output at odd columns
    b_ref : (1, Wp*Cp)          bias tiled over the Wp column groups
    se_ref: (Hp, Ho)            0/1 selectors of even conv rows
    so_ref: (Hp, Ho)            0/1 selectors of odd conv rows
    o_ref : (1, Hp, Wp*Cp)      pooled output
    """
    kh = we_ref.shape[0]
    hp, ho = se_ref.shape

    # Convolution as KH shifted row-slab matmuls (in-kernel im2col equivalent).
    xs = x_ref[0, 0:ho, :]
    acc_e = jnp.dot(xs, we_ref[0], preferred_element_type=jnp.float32)
    acc_o = jnp.dot(xs, wo_ref[0], preferred_element_type=jnp.float32)
    for di in range(1, kh):
        xs = x_ref[0, di:di + ho, :]
        acc_e += jnp.dot(xs, we_ref[di], preferred_element_type=jnp.float32)
        acc_o += jnp.dot(xs, wo_ref[di], preferred_element_type=jnp.float32)

    b = b_ref[...]
    # bias + ReLU, then pool along W (even vs odd conv columns).
    col = jnp.maximum(jnp.maximum(acc_e + b, 0.0),
                      jnp.maximum(acc_o + b, 0.0))          # (Ho, Wp*Cp)
    # pool along H via exact 0/1 row-selection matmuls.
    pooled = jnp.maximum(
        jnp.dot(se_ref[...], col, preferred_element_type=jnp.float32),
        jnp.dot(so_ref[...], col, preferred_element_type=jnp.float32))
    o_ref[0] = pooled.astype(o_ref.dtype)


def _fc3_kernel(x_ref, w1_ref, b1_ref, w2_ref, b2_ref, w3_ref, b3_ref, o_ref):
    """Fused fc1+ReLU, fc2+ReLU, fc3 on a row tile; all lanes padded to 128."""
    h = jnp.dot(x_ref[...], w1_ref[...], preferred_element_type=jnp.float32) + b1_ref[...]
    h = jnp.maximum(h, 0.0)
    h = jnp.dot(h, w2_ref[...], preferred_element_type=jnp.float32) + b2_ref[...]
    h = jnp.maximum(h, 0.0)
    o = jnp.dot(h, w3_ref[...], preferred_element_type=jnp.float32) + b3_ref[...]
    o_ref[...] = o.astype(o_ref.dtype)


# ------------------------------ pallas wrappers ------------------------------

def _full_spec(shape):
    return pl.BlockSpec(shape, lambda i: (0,) * len(shape))


def conv_relu_pool(x2d, we, wo, b_t, se, so):
    """x2d: (N, H, W*Cin) -> (N, Hp, Wp*Cp); grid over images, weights resident."""
    n, h, k = x2d.shape
    kh, _, ncol = we.shape
    hp, ho = se.shape
    return pl.pallas_call(
        _conv_relu_pool_kernel,
        out_shape=jax.ShapeDtypeStruct((n, hp, ncol), jnp.float32),
        grid=(n,),
        in_specs=[
            pl.BlockSpec((1, h, k), lambda i: (i, 0, 0)),
            _full_spec(we.shape), _full_spec(wo.shape), _full_spec(b_t.shape),
            _full_spec(se.shape), _full_spec(so.shape),
        ],
        out_specs=pl.BlockSpec((1, hp, ncol), lambda i: (i, 0, 0)),
        compiler_params=pltpu.CompilerParams(dimension_semantics=("parallel",)),
    )(x2d, we, wo, b_t, se, so)


def _row_tile(m):
    for t in (512, 256, 128, 64, 32, 16, 8):
        if m % t == 0:
            return t
    return m


def fc_fused(x, w1, b1, w2, b2, w3, b3):
    """x: (M, 400) -> padded logits (M, 128); grid over row tiles."""
    m, k = x.shape
    tm = _row_tile(m)
    nout = w3.shape[1]
    return pl.pallas_call(
        _fc3_kernel,
        out_shape=jax.ShapeDtypeStruct((m, nout), jnp.float32),
        grid=(m // tm,),
        in_specs=[
            pl.BlockSpec((tm, k), lambda i: (i, 0)),
            _full_spec(w1.shape), _full_spec(b1.shape),
            _full_spec(w2.shape), _full_spec(b2.shape),
            _full_spec(w3.shape), _full_spec(b3.shape),
        ],
        out_specs=pl.BlockSpec((tm, nout), lambda i: (i, 0)),
        compiler_params=pltpu.CompilerParams(dimension_semantics=("parallel",)),
    )(x, w1, b1, w2, b2, w3, b3)


# ----------------------- one-time parameter preparation -----------------------

def _toeplitz_conv(wt, cin_p, cout_p, W, Wp):
    """Build even/odd-column Toeplitz matmul weights for a valid conv.

    wt: (Cout, Cin, KH, KW) PyTorch conv weight.  Returns (we, wo), each of
    shape (KH, W*cin_p, Wp*cout_p), such that
        sum_di x2d[di:di+Ho, :] @ we[di]
    equals the conv output at even columns (wo: odd columns), with output lanes
    grouped as j_p*cout_p + co.
    """
    cout, cin, kh, kw = wt.shape
    wt = np.asarray(wt, np.float32)
    we = np.zeros((kh, W * cin_p, Wp * cout_p), np.float32)
    wo = np.zeros((kh, W * cin_p, Wp * cout_p), np.float32)
    for di in range(kh):
        for dj in range(kw):
            blk = wt[:, :, di, dj].T                    # (Cin, Cout)
            for jp in range(Wp):
                for tgt, off in ((we, 0), (wo, 1)):
                    w_idx = 2 * jp + off + dj
                    if w_idx < W:
                        tgt[di,
                            w_idx * cin_p: w_idx * cin_p + cin,
                            jp * cout_p: jp * cout_p + cout] = blk
    return jnp.asarray(we), jnp.asarray(wo)


def _tiled_bias(b, cout_p, Wp):
    cout = b.shape[0]
    bt = np.zeros((1, Wp * cout_p), np.float32)
    for jp in range(Wp):
        bt[0, jp * cout_p: jp * cout_p + cout] = np.asarray(b, np.float32)
    return jnp.asarray(bt)


def _pool_selectors(ho):
    hp = ho // 2
    se = np.zeros((hp, ho), np.float32)
    so = np.zeros((hp, ho), np.float32)
    se[np.arange(hp), 2 * np.arange(hp)] = 1.0
    so[np.arange(hp), 2 * np.arange(hp) + 1] = 1.0
    return jnp.asarray(se), jnp.asarray(so)


def prepare_params(p):
    """Transform PyTorch-layout params into kernel-ready layouts (done once)."""
    kp = {}
    # conv1: 32x32x3 -> conv 28x28x6 -> pool 14x14 (channels padded to C1P)
    kp["c1_we"], kp["c1_wo"] = _toeplitz_conv(p["conv1_w"], 3, C1P, W=32, Wp=14)
    kp["c1_b"] = _tiled_bias(p["conv1_b"], C1P, 14)
    kp["c1_se"], kp["c1_so"] = _pool_selectors(28)
    # conv2: 14x14xC1P -> conv 10x10x16 -> pool 5x5x16
    kp["c2_we"], kp["c2_wo"] = _toeplitz_conv(p["conv2_w"], C1P, C2P, W=14, Wp=5)
    kp["c2_b"] = _tiled_bias(p["conv2_b"], C2P, 5)
    kp["c2_se"], kp["c2_so"] = _pool_selectors(10)

    # FC stack, lane-padded to 128.  fc1 rows are permuted from PyTorch's NCHW
    # flatten order (c*25 + h*5 + w) to our conv2 output order (h*80 + w*16 + c).
    idx = np.arange(5 * 5 * C2P)
    h, rem = idx // (5 * C2P), idx % (5 * C2P)
    w, c = rem // C2P, rem % C2P
    torch_idx = c * 25 + h * 5 + w
    w1 = np.zeros((400, FCP), np.float32)
    w1[:, :120] = np.asarray(p["fc1_w"], np.float32).T[torch_idx]
    b1 = np.zeros((1, FCP), np.float32); b1[0, :120] = np.asarray(p["fc1_b"], np.float32)
    w2 = np.zeros((FCP, FCP), np.float32); w2[:120, :84] = np.asarray(p["fc2_w"], np.float32).T
    b2 = np.zeros((1, FCP), np.float32); b2[0, :84] = np.asarray(p["fc2_b"], np.float32)
    w3 = np.zeros((FCP, FCP), np.float32); w3[:84, :10] = np.asarray(p["fc3_w"], np.float32).T
    b3 = np.zeros((1, FCP), np.float32); b3[0, :10] = np.asarray(p["fc3_b"], np.float32)
    kp["w1"], kp["b1"] = jnp.asarray(w1), jnp.asarray(b1)
    kp["w2"], kp["b2"] = jnp.asarray(w2), jnp.asarray(b2)
    kp["w3"], kp["b3"] = jnp.asarray(w3), jnp.asarray(b3)
    return kp


# -------------------------------- LeNet model --------------------------------

def init_params(key):
    """Random params in PyTorch layouts (what nn.Module state_dict would give)."""
    ks = jax.random.split(key, 10)
    f32 = jnp.float32

    def w(k, shape, fan_in):
        return (jax.random.normal(k, shape, f32) * (1.0 / jnp.sqrt(fan_in))).astype(f32)

    return {
        "conv1_w": w(ks[0], (6, 3, 5, 5), 3 * 5 * 5),
        "conv1_b": w(ks[1], (6,), 3 * 5 * 5),
        "conv2_w": w(ks[2], (16, 6, 5, 5), 6 * 5 * 5),
        "conv2_b": w(ks[3], (16,), 6 * 5 * 5),
        "fc1_w": w(ks[4], (120, 400), 400),
        "fc1_b": w(ks[5], (120,), 400),
        "fc2_w": w(ks[6], (84, 120), 120),
        "fc2_b": w(ks[7], (84,), 120),
        "fc3_w": w(ks[8], (10, 84), 84),
        "fc3_b": w(ks[9], (10,), 84),
    }


def lenet_forward(x_nchw, kp):
    n = x_nchw.shape[0]
    # NCHW -> (N, H, W*Cin): pure layout glue, no data inflation.
    x = jnp.transpose(x_nchw, (0, 2, 3, 1)).astype(jnp.float32).reshape(n, 32, 32 * 3)
    x = conv_relu_pool(x, kp["c1_we"], kp["c1_wo"], kp["c1_b"],
                       kp["c1_se"], kp["c1_so"])                 # (N, 14, 14*C1P)
    x = conv_relu_pool(x, kp["c2_we"], kp["c2_wo"], kp["c2_b"],
                       kp["c2_se"], kp["c2_so"])                 # (N, 5, 5*C2P)
    x = x.reshape(n, 5 * 5 * C2P)                                # (N, 400)
    logits = fc_fused(x, kp["w1"], kp["b1"], kp["w2"], kp["b2"],
                      kp["w3"], kp["b3"])                        # (N, 128) lane-dense
    return logits[:, :10]


# ----------------------- pure-JAX reference (sanity only) ---------------------

def _reference_forward(x_nchw, p):
    x = jnp.transpose(x_nchw, (0, 2, 3, 1)).astype(jnp.float32)

    def conv_relu(x, w, b):
        Cout, Cin, KH, KW = w.shape
        N, H, W, _ = x.shape
        Ho, Wo = H - KH + 1, W - KW + 1
        cols = [x[:, i:i + Ho, j:j + Wo, :] for i in range(KH) for j in range(KW)]
        patches = jnp.concatenate(cols, axis=-1).reshape(N * Ho * Wo, KH * KW * Cin)
        w2 = jnp.transpose(w, (2, 3, 1, 0)).reshape(KH * KW * Cin, Cout)
        out = patches @ w2 + b
        return jnp.maximum(out, 0.0).reshape(N, Ho, Wo, Cout)

    def pool(x):
        a = x[:, 0::2, 0::2, :]; b = x[:, 0::2, 1::2, :]
        c = x[:, 1::2, 0::2, :]; d = x[:, 1::2, 1::2, :]
        return jnp.maximum(jnp.maximum(a, b), jnp.maximum(c, d))

    x = pool(conv_relu(x, p["conv1_w"], p["conv1_b"]))
    x = pool(conv_relu(x, p["conv2_w"], p["conv2_b"]))
    n = x.shape[0]
    x = jnp.transpose(x, (0, 3, 1, 2)).reshape(n, 400)           # PyTorch view(N,-1)
    x = jnp.maximum(x @ p["fc1_w"].T + p["fc1_b"], 0.0)
    x = jnp.maximum(x @ p["fc2_w"].T + p["fc2_b"], 0.0)
    return x @ p["fc3_w"].T + p["fc3_b"]


if __name__ == "__main__":
    key = jax.random.PRNGKey(0)
    k_in, k_par = jax.random.split(key)

    # CIFAR-shaped input (fc1 = 16*5*5 forces 32x32 spatial); small batch.
    x = jax.random.normal(k_in, (2, 3, 32, 32), jnp.float32)
    params = init_params(k_par)
    kparams = prepare_params(params)

    fwd = jax.jit(lenet_forward)
    out = jax.block_until_ready(fwd(x, kparams))
    assert out.shape == (2, 10) and out.dtype == jnp.float32

    # sanity check the fused kernels against a pure-JAX reference
    ref = jax.block_until_ready(_reference_forward(x, params))
    err = float(jnp.max(jnp.abs(out - ref)))
    assert err < 5e-2, f"kernel/reference mismatch: max abs err = {err}"

    print("KERNEL_OK")
</pallas_src>

<mosaic_0001>
module attributes {stable_mosaic.version = 11 : i64} {
  func.func @_conv_relu_pool_kernel(%arg0: i32, %arg1: memref<1x32x96xf32, #tpu.memory_space<vmem>>, %arg2: memref<5x96x112xf32, #tpu.memory_space<vmem>>, %arg3: memref<5x96x112xf32, #tpu.memory_space<vmem>>, %arg4: memref<1x112xf32, #tpu.memory_space<vmem>>, %arg5: memref<14x28xf32, #tpu.memory_space<vmem>>, %arg6: memref<14x28xf32, #tpu.memory_space<vmem>>, %arg7: memref<1x14x112xf32, #tpu.memory_space<vmem>>) attributes {dimension_semantics = [#tpu.dimension_semantics<parallel>], iteration_bounds = array<i64: 2>, scalar_prefetch = 0 : i64, scratch_operands = 0 : i64, tpu.core_type = #tpu.core_type<tc>, window_params = [{transform_indices = @transform_0, window_bounds = array<i64: 1, 32, 96>}, {pipeline_mode = #tpu.pipeline_mode<synchronous>, transform_indices = @transform_1, window_bounds = array<i64: 5, 96, 112>}, {pipeline_mode = #tpu.pipeline_mode<synchronous>, transform_indices = @transform_2, window_bounds = array<i64: 5, 96, 112>}, {pipeline_mode = #tpu.pipeline_mode<synchronous>, transform_indices = @transform_3, window_bounds = array<i64: 1, 112>}, {pipeline_mode = #tpu.pipeline_mode<synchronous>, transform_indices = @transform_4, window_bounds = array<i64: 14, 28>}, {pipeline_mode = #tpu.pipeline_mode<synchronous>, transform_indices = @transform_5, window_bounds = array<i64: 14, 28>}, {transform_indices = @transform_6, window_bounds = array<i64: 1, 14, 112>}]} {
    %c0 = arith.constant 0 : index
    %c0_0 = arith.constant 0 : index
    %c0_1 = arith.constant 0 : index
    %0 = vector.load %arg1[%c0, %c0_0, %c0_1] : memref<1x32x96xf32, #tpu.memory_space<vmem>>, vector<1x28x96xf32>
    %1 = vector.shape_cast %0 : vector<1x28x96xf32> to vector<28x96xf32>
    %c0_2 = arith.constant 0 : index
    %c0_3 = arith.constant 0 : index
    %c0_4 = arith.constant 0 : index
    %2 = vector.load %arg2[%c0_2, %c0_3, %c0_4] : memref<5x96x112xf32, #tpu.memory_space<vmem>>, vector<1x96x112xf32>
    %3 = vector.shape_cast %2 : vector<1x96x112xf32> to vector<96x112xf32>
    %cst = arith.constant dense<0.000000e+00> : vector<28x112xf32>
    %4 = tpu.matmul %1, %3, %cst {dimension_numbers = #tpu.dot_dimension_numbers<[1], [0], [0], [1], [0, 0, 1, 1], [], []>} : vector<28x96xf32>, vector<96x112xf32>, vector<28x112xf32> -> vector<28x112xf32>
    %c0_5 = arith.constant 0 : index
    %c0_6 = arith.constant 0 : index
    %c0_7 = arith.constant 0 : index
    %5 = vector.load %arg3[%c0_5, %c0_6, %c0_7] : memref<5x96x112xf32, #tpu.memory_space<vmem>>, vector<1x96x112xf32>
    %6 = vector.shape_cast %5 : vector<1x96x112xf32> to vector<96x112xf32>
    %cst_8 = arith.constant dense<0.000000e+00> : vector<28x112xf32>
    %7 = tpu.matmul %1, %6, %cst_8 {dimension_numbers = #tpu.dot_dimension_numbers<[1], [0], [0], [1], [0, 0, 1, 1], [], []>} : vector<28x96xf32>, vector<96x112xf32>, vector<28x112xf32> -> vector<28x112xf32>
    %c0_9 = arith.constant 0 : index
    %c1 = arith.constant 1 : index
    %c0_10 = arith.constant 0 : index
    %8 = vector.load %arg1[%c0_9, %c1, %c0_10] : memref<1x32x96xf32, #tpu.memory_space<vmem>>, vector<1x28x96xf32>
    %9 = vector.shape_cast %8 : vector<1x28x96xf32> to vector<28x96xf32>
    %c1_11 = arith.constant 1 : index
    %c0_12 = arith.constant 0 : index
    %c0_13 = arith.constant 0 : index
    %10 = vector.load %arg2[%c1_11, %c0_12, %c0_13] : memref<5x96x112xf32, #tpu.memory_space<vmem>>, vector<1x96x112xf32>
    %11 = vector.shape_cast %10 : vector<1x96x112xf32> to vector<96x112xf32>
    %cst_14 = arith.constant dense<0.000000e+00> : vector<28x112xf32>
    %12 = tpu.matmul %9, %11, %cst_14 {dimension_numbers = #tpu.dot_dimension_numbers<[1], [0], [0], [1], [0, 0, 1, 1], [], []>} : vector<28x96xf32>, vector<96x112xf32>, vector<28x112xf32> -> vector<28x112xf32>
    %13 = arith.addf %4, %12 : vector<28x112xf32>
    %c1_15 = arith.constant 1 : index
    %c0_16 = arith.constant 0 : index
    %c0_17 = arith.constant 0 : index
    %14 = vector.load %arg3[%c1_15, %c0_16, %c0_17] : memref<5x96x112xf32, #tpu.memory_space<vmem>>, vector<1x96x112xf32>
    %15 = vector.shape_cast %14 : vector<1x96x112xf32> to vector<96x112xf32>
    %cst_18 = arith.constant dense<0.000000e+00> : vector<28x112xf32>
    %16 = tpu.matmul %9, %15, %cst_18 {dimension_numbers = #tpu.dot_dimension_numbers<[1], [0], [0], [1], [0, 0, 1, 1], [], []>} : vector<28x96xf32>, vector<96x112xf32>, vector<28x112xf32> -> vector<28x112xf32>
    %17 = arith.addf %7, %16 : vector<28x112xf32>
    %c0_19 = arith.constant 0 : index
    %c2 = arith.constant 2 : index
    %c0_20 = arith.constant 0 : index
    %18 = vector.load %arg1[%c0_19, %c2, %c0_20] : memref<1x32x96xf32, #tpu.memory_space<vmem>>, vector<1x28x96xf32>
    %19 = vector.shape_cast %18 : vector<1x28x96xf32> to vector<28x96xf32>
    %c2_21 = arith.constant 2 : index
    %c0_22 = arith.constant 0 : index
    %c0_23 = arith.constant 0 : index
    %20 = vector.load %arg2[%c2_21, %c0_22, %c0_23] : memref<5x96x112xf32, #tpu.memory_space<vmem>>, vector<1x96x112xf32>
    %21 = vector.shape_cast %20 : vector<1x96x112xf32> to vector<96x112xf32>
    %cst_24 = arith.constant dense<0.000000e+00> : vector<28x112xf32>
    %22 = tpu.matmul %19, %21, %cst_24 {dimension_numbers = #tpu.dot_dimension_numbers<[1], [0], [0], [1], [0, 0, 1, 1], [], []>} : vector<28x96xf32>, vector<96x112xf32>, vector<28x112xf32> -> vector<28x112xf32>
    %23 = arith.addf %13, %22 : vector<28x112xf32>
    %c2_25 = arith.constant 2 : index
    %c0_26 = arith.constant 0 : index
    %c0_27 = arith.constant 0 : index
    %24 = vector.load %arg3[%c2_25, %c0_26, %c0_27] : memref<5x96x112xf32, #tpu.memory_space<vmem>>, vector<1x96x112xf32>
    %25 = vector.shape_cast %24 : vector<1x96x112xf32> to vector<96x112xf32>
    %cst_28 = arith.constant dense<0.000000e+00> : vector<28x112xf32>
    %26 = tpu.matmul %19, %25, %cst_28 {dimension_numbers = #tpu.dot_dimension_numbers<[1], [0], [0], [1], [0, 0, 1, 1], [], []>} : vector<28x96xf32>, vector<96x112xf32>, vector<28x112xf32> -> vector<28x112xf32>
    %27 = arith.addf %17, %26 : vector<28x112xf32>
    %c0_29 = arith.constant 0 : index
    %c3 = arith.constant 3 : index
    %c0_30 = arith.constant 0 : index
    %28 = vector.load %arg1[%c0_29, %c3, %c0_30] : memref<1x32x96xf32, #tpu.memory_space<vmem>>, vector<1x28x96xf32>
    %29 = vector.shape_cast %28 : vector<1x28x96xf32> to vector<28x96xf32>
    %c3_31 = arith.constant 3 : index
    %c0_32 = arith.constant 0 : index
    %c0_33 = arith.constant 0 : index
    %30 = vector.load %arg2[%c3_31, %c0_32, %c0_33] : memref<5x96x112xf32, #tpu.memory_space<vmem>>, vector<1x96x112xf32>
    %31 = vector.shape_cast %30 : vector<1x96x112xf32> to vector<96x112xf32>
    %cst_34 = arith.constant dense<0.000000e+00> : vector<28x112xf32>
    %32 = tpu.matmul %29, %31, %cst_34 {dimension_numbers = #tpu.dot_dimension_numbers<[1], [0], [0], [1], [0, 0, 1, 1], [], []>} : vector<28x96xf32>, vector<96x112xf32>, vector<28x112xf32> -> vector<28x112xf32>
    %33 = arith.addf %23, %32 : vector<28x112xf32>
    %c3_35 = arith.constant 3 : index
    %c0_36 = arith.constant 0 : index
    %c0_37 = arith.constant 0 : index
    %34 = vector.load %arg3[%c3_35, %c0_36, %c0_37] : memref<5x96x112xf32, #tpu.memory_space<vmem>>, vector<1x96x112xf32>
    %35 = vector.shape_cast %34 : vector<1x96x112xf32> to vector<96x112xf32>
    %cst_38 = arith.constant dense<0.000000e+00> : vector<28x112xf32>
    %36 = tpu.matmul %29, %35, %cst_38 {dimension_numbers = #tpu.dot_dimension_numbers<[1], [0], [0], [1], [0, 0, 1, 1], [], []>} : vector<28x96xf32>, vector<96x112xf32>, vector<28x112xf32> -> vector<28x112xf32>
    %37 = arith.addf %27, %36 : vector<28x112xf32>
    %c0_39 = arith.constant 0 : index
    %c4 = arith.constant 4 : index
    %c0_40 = arith.constant 0 : index
    %38 = vector.load %arg1[%c0_39, %c4, %c0_40] : memref<1x32x96xf32, #tpu.memory_space<vmem>>, vector<1x28x96xf32>
    %39 = vector.shape_cast %38 : vector<1x28x96xf32> to vector<28x96xf32>
    %c4_41 = arith.constant 4 : index
    %c0_42 = arith.constant 0 : index
    %c0_43 = arith.constant 0 : index
    %40 = vector.load %arg2[%c4_41, %c0_42, %c0_43] : memref<5x96x112xf32, #tpu.memory_space<vmem>>, vector<1x96x112xf32>
    %41 = vector.shape_cast %40 : vector<1x96x112xf32> to vector<96x112xf32>
    %cst_44 = arith.constant dense<0.000000e+00> : vector<28x112xf32>
    %42 = tpu.matmul %39, %41, %cst_44 {dimension_numbers = #tpu.dot_dimension_numbers<[1], [0], [0], [1], [0, 0, 1, 1], [], []>} : vector<28x96xf32>, vector<96x112xf32>, vector<28x112xf32> -> vector<28x112xf32>
    %43 = arith.addf %33, %42 : vector<28x112xf32>
    %c4_45 = arith.constant 4 : index
    %c0_46 = arith.constant 0 : index
    %c0_47 = arith.constant 0 : index
    %44 = vector.load %arg3[%c4_45, %c0_46, %c0_47] : memref<5x96x112xf32, #tpu.memory_space<vmem>>, vector<1x96x112xf32>
    %45 = vector.shape_cast %44 : vector<1x96x112xf32> to vector<96x112xf32>
    %cst_48 = arith.constant dense<0.000000e+00> : vector<28x112xf32>
    %46 = tpu.matmul %39, %45, %cst_48 {dimension_numbers = #tpu.dot_dimension_numbers<[1], [0], [0], [1], [0, 0, 1, 1], [], []>} : vector<28x96xf32>, vector<96x112xf32>, vector<28x112xf32> -> vector<28x112xf32>
    %47 = arith.addf %37, %46 : vector<28x112xf32>
    %c0_49 = arith.constant 0 : index
    %c0_50 = arith.constant 0 : index
    %48 = vector.load %arg4[%c0_49, %c0_50] : memref<1x112xf32, #tpu.memory_space<vmem>>, vector<1x112xf32>
    %49 = vector.broadcast %48 : vector<1x112xf32> to vector<28x112xf32>
    %50 = arith.addf %43, %49 : vector<28x112xf32>
    %cst_51 = arith.constant 0.000000e+00 : f32
    %51 = vector.broadcast %cst_51 : f32 to vector<28x112xf32>
    %52 = arith.maximumf %50, %51 : vector<28x112xf32>
    %53 = vector.broadcast %48 : vector<1x112xf32> to vector<28x112xf32>
    %54 = arith.addf %47, %53 : vector<28x112xf32>
    %cst_52 = arith.constant 0.000000e+00 : f32
    %55 = vector.broadcast %cst_52 : f32 to vector<28x112xf32>
    %56 = arith.maximumf %54, %55 : vector<28x112xf32>
    %57 = arith.maximumf %52, %56 : vector<28x112xf32>
    %c0_53 = arith.constant 0 : index
    %c0_54 = arith.constant 0 : index
    %58 = vector.load %arg5[%c0_53, %c0_54] : memref<14x28xf32, #tpu.memory_space<vmem>>, vector<14x28xf32>
    %cst_55 = arith.constant dense<0.000000e+00> : vector<14x112xf32>
    %59 = tpu.matmul %58, %57, %cst_55 {dimension_numbers = #tpu.dot_dimension_numbers<[1], [0], [0], [1], [0, 0, 1, 1], [], []>} : vector<14x28xf32>, vector<28x112xf32>, vector<14x112xf32> -> vector<14x112xf32>
    %c0_56 = arith.constant 0 : index
    %c0_57 = arith.constant 0 : index
    %60 = vector.load %arg6[%c0_56, %c0_57] : memref<14x28xf32, #tpu.memory_space<vmem>>, vector<14x28xf32>
    %cst_58 = arith.constant dense<0.000000e+00> : vector<14x112xf32>
    %61 = tpu.matmul %60, %57, %cst_58 {dimension_numbers = #tpu.dot_dimension_numbers<[1], [0], [0], [1], [0, 0, 1, 1], [], []>} : vector<14x28xf32>, vector<28x112xf32>, vector<14x112xf32> -> vector<14x112xf32>
    %62 = arith.maximumf %59, %61 : vector<14x112xf32>
    %c0_59 = arith.constant 0 : index
    %c0_60 = arith.constant 0 : index
    %c0_61 = arith.constant 0 : index
    %63 = vector.load %arg7[%c0_59, %c0_60, %c0_61] : memref<1x14x112xf32, #tpu.memory_space<vmem>>, vector<1x14x112xf32>
    %64 = vector.shape_cast %63 : vector<1x14x112xf32> to vector<14x112xf32>
    %65 = vector.shape_cast %62 : vector<14x112xf32> to vector<1x14x112xf32>
    tpu.vector_store %arg7[%c0_59, %c0_60, %c0_61], %65 {strides = array<i32>} : memref<1x14x112xf32, #tpu.memory_space<vmem>>, vector<1x14x112xf32>,
    return
  }
  func.func @transform_0(%arg0: i32) -> (i32, i32, i32) {
    %c0_i32 = arith.constant 0 : i32
    %c0_i32_0 = arith.constant 0 : i32
    %c0_i32_1 = arith.constant 0 : i32
    return %arg0, %c0_i32, %c0_i32_0 : i32, i32, i32
  }
  func.func @transform_1(%arg0: i32) -> (i32, i32, i32) {
    %c0_i32 = arith.constant 0 : i32
    %c0_i32_0 = arith.constant 0 : i32
    %c0_i32_1 = arith.constant 0 : i32
    %c0_i32_2 = arith.constant 0 : i32
    return %c0_i32, %c0_i32_0, %c0_i32_1 : i32, i32, i32
  }
  func.func @transform_2(%arg0: i32) -> (i32, i32, i32) {
    %c0_i32 = arith.constant 0 : i32
    %c0_i32_0 = arith.constant 0 : i32
    %c0_i32_1 = arith.constant 0 : i32
    %c0_i32_2 = arith.constant 0 : i32
    return %c0_i32, %c0_i32_0, %c0_i32_1 : i32, i32, i32
  }
  func.func @transform_3(%arg0: i32) -> (i32, i32) {
    %c0_i32 = arith.constant 0 : i32
    %c0_i32_0 = arith.constant 0 : i32
    %c0_i32_1 = arith.constant 0 : i32
    return %c0_i32, %c0_i32_0 : i32, i32
  }
  func.func @transform_4(%arg0: i32) -> (i32, i32) {
    %c0_i32 = arith.constant 0 : i32
    %c0_i32_0 = arith.constant 0 : i32
    %c0_i32_1 = arith.constant 0 : i32
    return %c0_i32, %c0_i32_0 : i32, i32
  }
  func.func @transform_5(%arg0: i32) -> (i32, i32) {
    %c0_i32 = arith.constant 0 : i32
    %c0_i32_0 = arith.constant 0 : i32
    %c0_i32_1 = arith.constant 0 : i32
    return %c0_i32, %c0_i32_0 : i32, i32
  }
  func.func @transform_6(%arg0: i32) -> (i32, i32, i32) {
    %c0_i32 = arith.constant 0 : i32
    %c0_i32_0 = arith.constant 0 : i32
    %c0_i32_1 = arith.constant 0 : i32
    return %arg0, %c0_i32, %c0_i32_0 : i32, i32, i32
  }
}

module attributes {stable_mosaic.version = 11 : i64} {
  func.func @_conv_relu_pool_kernel(%arg0: i32, %arg1: memref<1x14x112xf32, #tpu.memory_space<vmem>>, %arg2: memref<5x112x80xf32, #tpu.memory_space<vmem>>, %arg3: memref<5x112x80xf32, #tpu.memory_space<vmem>>, %arg4: memref<1x80xf32, #tpu.memory_space<vmem>>, %arg5: memref<5x10xf32, #tpu.memory_space<vmem>>, %arg6: memref<5x10xf32, #tpu.memory_space<vmem>>, %arg7: memref<1x5x80xf32, #tpu.memory_space<vmem>>) attributes {dimension_semantics = [#tpu.dimension_semantics<parallel>], iteration_bounds = array<i64: 2>, scalar_prefetch = 0 : i64, scratch_operands = 0 : i64, tpu.core_type = #tpu.core_type<tc>, window_params = [{transform_indices = @transform_0, window_bounds = array<i64: 1, 14, 112>}, {pipeline_mode = #tpu.pipeline_mode<synchronous>, transform_indices = @transform_1, window_bounds = array<i64: 5, 112, 80>}, {pipeline_mode = #tpu.pipeline_mode<synchronous>, transform_indices = @transform_2, window_bounds = array<i64: 5, 112, 80>}, {pipeline_mode = #tpu.pipeline_mode<synchronous>, transform_indices = @transform_3, window_bounds = array<i64: 1, 80>}, {pipeline_mode = #tpu.pipeline_mode<synchronous>, transform_indices = @transform_4, window_bounds = array<i64: 5, 10>}, {pipeline_mode = #tpu.pipeline_mode<synchronous>, transform_indices = @transform_5, window_bounds = array<i64: 5, 10>}, {transform_indices = @transform_6, window_bounds = array<i64: 1, 5, 80>}]} {
    %c0 = arith.constant 0 : index
    %c0_0 = arith.constant 0 : index
    %c0_1 = arith.constant 0 : index
    %0 = vector.load %arg1[%c0, %c0_0, %c0_1] : memref<1x14x112xf32, #tpu.memory_space<vmem>>, vector<1x10x112xf32>
    %1 = vector.shape_cast %0 : vector<1x10x112xf32> to vector<10x112xf32>
    %c0_2 = arith.constant 0 : index
    %c0_3 = arith.constant 0 : index
    %c0_4 = arith.constant 0 : index
    %2 = vector.load %arg2[%c0_2, %c0_3, %c0_4] : memref<5x112x80xf32, #tpu.memory_space<vmem>>, vector<1x112x80xf32>
    %3 = vector.shape_cast %2 : vector<1x112x80xf32> to vector<112x80xf32>
    %cst = arith.constant dense<0.000000e+00> : vector<10x80xf32>
    %4 = tpu.matmul %1, %3, %cst {dimension_numbers = #tpu.dot_dimension_numbers<[1], [0], [0], [1], [0, 0, 1, 1], [], []>} : vector<10x112xf32>, vector<112x80xf32>, vector<10x80xf32> -> vector<10x80xf32>
    %c0_5 = arith.constant 0 : index
    %c0_6 = arith.constant 0 : index
    %c0_7 = arith.constant 0 : index
    %5 = vector.load %arg3[%c0_5, %c0_6, %c0_7] : memref<5x112x80xf32, #tpu.memory_space<vmem>>, vector<1x112x80xf32>
    %6 = vector.shape_cast %5 : vector<1x112x80xf32> to vector<112x80xf32>
    %cst_8 = arith.constant dense<0.000000e+00> : vector<10x80xf32>
    %7 = tpu.matmul %1, %6, %cst_8 {dimension_numbers = #tpu.dot_dimension_numbers<[1], [0], [0], [1], [0, 0, 1, 1], [], []>} : vector<10x112xf32>, vector<112x80xf32>, vector<10x80xf32> -> vector<10x80xf32>
    %c0_9 = arith.constant 0 : index
    %c1 = arith.constant 1 : index
    %c0_10 = arith.constant 0 : index
    %8 = vector.load %arg1[%c0_9, %c1, %c0_10] : memref<1x14x112xf32, #tpu.memory_space<vmem>>, vector<1x10x112xf32>
    %9 = vector.shape_cast %8 : vector<1x10x112xf32> to vector<10x112xf32>
    %c1_11 = arith.constant 1 : index
    %c0_12 = arith.constant 0 : index
    %c0_13 = arith.constant 0 : index
    %10 = vector.load %arg2[%c1_11, %c0_12, %c0_13] : memref<5x112x80xf32, #tpu.memory_space<vmem>>, vector<1x112x80xf32>
    %11 = vector.shape_cast %10 : vector<1x112x80xf32> to vector<112x80xf32>
    %cst_14 = arith.constant dense<0.000000e+00> : vector<10x80xf32>
    %12 = tpu.matmul %9, %11, %cst_14 {dimension_numbers = #tpu.dot_dimension_numbers<[1], [0], [0], [1], [0, 0, 1, 1], [], []>} : vector<10x112xf32>, vector<112x80xf32>, vector<10x80xf32> -> vector<10x80xf32>
    %13 = arith.addf %4, %12 : vector<10x80xf32>
    %c1_15 = arith.constant 1 : index
    %c0_16 = arith.constant 0 : index
    %c0_17 = arith.constant 0 : index
    %14 = vector.load %arg3[%c1_15, %c0_16, %c0_17] : memref<5x112x80xf32, #tpu.memory_space<vmem>>, vector<1x112x80xf32>
    %15 = vector.shape_cast %14 : vector<1x112x80xf32> to vector<112x80xf32>
    %cst_18 = arith.constant dense<0.000000e+00> : vector<10x80xf32>
    %16 = tpu.matmul %9, %15, %cst_18 {dimension_numbers = #tpu.dot_dimension_numbers<[1], [0], [0], [1], [0, 0, 1, 1], [], []>} : vector<10x112xf32>, vector<112x80xf32>, vector<10x80xf32> -> vector<10x80xf32>
    %17 = arith.addf %7, %16 : vector<10x80xf32>
    %c0_19 = arith.constant 0 : index
    %c2 = arith.constant 2 : index
    %c0_20 = arith.constant 0 : index
    %18 = vector.load %arg1[%c0_19, %c2, %c0_20] : memref<1x14x112xf32, #tpu.memory_space<vmem>>, vector<1x10x112xf32>
    %19 = vector.shape_cast %18 : vector<1x10x112xf32> to vector<10x112xf32>
    %c2_21 = arith.constant 2 : index
    %c0_22 = arith.constant 0 : index
    %c0_23 = arith.constant 0 : index
    %20 = vector.load %arg2[%c2_21, %c0_22, %c0_23] : memref<5x112x80xf32, #tpu.memory_space<vmem>>, vector<1x112x80xf32>
    %21 = vector.shape_cast %20 : vector<1x112x80xf32> to vector<112x80xf32>
    %cst_24 = arith.constant dense<0.000000e+00> : vector<10x80xf32>
    %22 = tpu.matmul %19, %21, %cst_24 {dimension_numbers = #tpu.dot_dimension_numbers<[1], [0], [0], [1], [0, 0, 1, 1], [], []>} : vector<10x112xf32>, vector<112x80xf32>, vector<10x80xf32> -> vector<10x80xf32>
    %23 = arith.addf %13, %22 : vector<10x80xf32>
    %c2_25 = arith.constant 2 : index
    %c0_26 = arith.constant 0 : index
    %c0_27 = arith.constant 0 : index
    %24 = vector.load %arg3[%c2_25, %c0_26, %c0_27] : memref<5x112x80xf32, #tpu.memory_space<vmem>>, vector<1x112x80xf32>
    %25 = vector.shape_cast %24 : vector<1x112x80xf32> to vector<112x80xf32>
    %cst_28 = arith.constant dense<0.000000e+00> : vector<10x80xf32>
    %26 = tpu.matmul %19, %25, %cst_28 {dimension_numbers = #tpu.dot_dimension_numbers<[1], [0], [0], [1], [0, 0, 1, 1], [], []>} : vector<10x112xf32>, vector<112x80xf32>, vector<10x80xf32> -> vector<10x80xf32>
    %27 = arith.addf %17, %26 : vector<10x80xf32>
    %c0_29 = arith.constant 0 : index
    %c3 = arith.constant 3 : index
    %c0_30 = arith.constant 0 : index
    %28 = vector.load %arg1[%c0_29, %c3, %c0_30] : memref<1x14x112xf32, #tpu.memory_space<vmem>>, vector<1x10x112xf32>
    %29 = vector.shape_cast %28 : vector<1x10x112xf32> to vector<10x112xf32>
    %c3_31 = arith.constant 3 : index
    %c0_32 = arith.constant 0 : index
    %c0_33 = arith.constant 0 : index
    %30 = vector.load %arg2[%c3_31, %c0_32, %c0_33] : memref<5x112x80xf32, #tpu.memory_space<vmem>>, vector<1x112x80xf32>
    %31 = vector.shape_cast %30 : vector<1x112x80xf32> to vector<112x80xf32>
    %cst_34 = arith.constant dense<0.000000e+00> : vector<10x80xf32>
    %32 = tpu.matmul %29, %31, %cst_34 {dimension_numbers = #tpu.dot_dimension_numbers<[1], [0], [0], [1], [0, 0, 1, 1], [], []>} : vector<10x112xf32>, vector<112x80xf32>, vector<10x80xf32> -> vector<10x80xf32>
    %33 = arith.addf %23, %32 : vector<10x80xf32>
    %c3_35 = arith.constant 3 : index
    %c0_36 = arith.constant 0 : index
    %c0_37 = arith.constant 0 : index
    %34 = vector.load %arg3[%c3_35, %c0_36, %c0_37] : memref<5x112x80xf32, #tpu.memory_space<vmem>>, vector<1x112x80xf32>
    %35 = vector.shape_cast %34 : vector<1x112x80xf32> to vector<112x80xf32>
    %cst_38 = arith.constant dense<0.000000e+00> : vector<10x80xf32>
    %36 = tpu.matmul %29, %35, %cst_38 {dimension_numbers = #tpu.dot_dimension_numbers<[1], [0], [0], [1], [0, 0, 1, 1], [], []>} : vector<10x112xf32>, vector<112x80xf32>, vector<10x80xf32> -> vector<10x80xf32>
    %37 = arith.addf %27, %36 : vector<10x80xf32>
    %c0_39 = arith.constant 0 : index
    %c4 = arith.constant 4 : index
    %c0_40 = arith.constant 0 : index
    %38 = vector.load %arg1[%c0_39, %c4, %c0_40] : memref<1x14x112xf32, #tpu.memory_space<vmem>>, vector<1x10x112xf32>
    %39 = vector.shape_cast %38 : vector<1x10x112xf32> to vector<10x112xf32>
    %c4_41 = arith.constant 4 : index
    %c0_42 = arith.constant 0 : index
    %c0_43 = arith.constant 0 : index
    %40 = vector.load %arg2[%c4_41, %c0_42, %c0_43] : memref<5x112x80xf32, #tpu.memory_space<vmem>>, vector<1x112x80xf32>
    %41 = vector.shape_cast %40 : vector<1x112x80xf32> to vector<112x80xf32>
    %cst_44 = arith.constant dense<0.000000e+00> : vector<10x80xf32>
    %42 = tpu.matmul %39, %41, %cst_44 {dimension_numbers = #tpu.dot_dimension_numbers<[1], [0], [0], [1], [0, 0, 1, 1], [], []>} : vector<10x112xf32>, vector<112x80xf32>, vector<10x80xf32> -> vector<10x80xf32>
    %43 = arith.addf %33, %42 : vector<10x80xf32>
    %c4_45 = arith.constant 4 : index
    %c0_46 = arith.constant 0 : index
    %c0_47 = arith.constant 0 : index
    %44 = vector.load %arg3[%c4_45, %c0_46, %c0_47] : memref<5x112x80xf32, #tpu.memory_space<vmem>>, vector<1x112x80xf32>
    %45 = vector.shape_cast %44 : vector<1x112x80xf32> to vector<112x80xf32>
    %cst_48 = arith.constant dense<0.000000e+00> : vector<10x80xf32>
    %46 = tpu.matmul %39, %45, %cst_48 {dimension_numbers = #tpu.dot_dimension_numbers<[1], [0], [0], [1], [0, 0, 1, 1], [], []>} : vector<10x112xf32>, vector<112x80xf32>, vector<10x80xf32> -> vector<10x80xf32>
    %47 = arith.addf %37, %46 : vector<10x80xf32>
    %c0_49 = arith.constant 0 : index
    %c0_50 = arith.constant 0 : index
    %48 = vector.load %arg4[%c0_49, %c0_50] : memref<1x80xf32, #tpu.memory_space<vmem>>, vector<1x80xf32>
    %49 = vector.broadcast %48 : vector<1x80xf32> to vector<10x80xf32>
    %50 = arith.addf %43, %49 : vector<10x80xf32>
    %cst_51 = arith.constant 0.000000e+00 : f32
    %51 = vector.broadcast %cst_51 : f32 to vector<10x80xf32>
    %52 = arith.maximumf %50, %51 : vector<10x80xf32>
    %53 = vector.broadcast %48 : vector<1x80xf32> to vector<10x80xf32>
    %54 = arith.addf %47, %53 : vector<10x80xf32>
    %cst_52 = arith.constant 0.000000e+00 : f32
    %55 = vector.broadcast %cst_52 : f32 to vector<10x80xf32>
    %56 = arith.maximumf %54, %55 : vector<10x80xf32>
    %57 = arith.maximumf %52, %56 : vector<10x80xf32>
    %c0_53 = arith.constant 0 : index
    %c0_54 = arith.constant 0 : index
    %58 = vector.load %arg5[%c0_53, %c0_54] : memref<5x10xf32, #tpu.memory_space<vmem>>, vector<5x10xf32>
    %cst_55 = arith.constant dense<0.000000e+00> : vector<5x80xf32>
    %59 = tpu.matmul %58, %57, %cst_55 {dimension_numbers = #tpu.dot_dimension_numbers<[1], [0], [0], [1], [0, 0, 1, 1], [], []>} : vector<5x10xf32>, vector<10x80xf32>, vector<5x80xf32> -> vector<5x80xf32>
    %c0_56 = arith.constant 0 : index
    %c0_57 = arith.constant 0 : index
    %60 = vector.load %arg6[%c0_56, %c0_57] : memref<5x10xf32, #tpu.memory_space<vmem>>, vector<5x10xf32>
    %cst_58 = arith.constant dense<0.000000e+00> : vector<5x80xf32>
    %61 = tpu.matmul %60, %57, %cst_58 {dimension_numbers = #tpu.dot_dimension_numbers<[1], [0], [0], [1], [0, 0, 1, 1], [], []>} : vector<5x10xf32>, vector<10x80xf32>, vector<5x80xf32> -> vector<5x80xf32>
    %62 = arith.maximumf %59, %61 : vector<5x80xf32>
    %c0_59 = arith.constant 0 : index
    %c0_60 = arith.constant 0 : index
    %c0_61 = arith.constant 0 : index
    %63 = vector.load %arg7[%c0_59, %c0_60, %c0_61] : memref<1x5x80xf32, #tpu.memory_space<vmem>>, vector<1x5x80xf32>
    %64 = vector.shape_cast %63 : vector<1x5x80xf32> to vector<5x80xf32>
    %65 = vector.shape_cast %62 : vector<5x80xf32> to vector<1x5x80xf32>
    tpu.vector_store %arg7[%c0_59, %c0_60, %c0_61], %65 {strides = array<i32>} : memref<1x5x80xf32, #tpu.memory_space<vmem>>, vector<1x5x80xf32>,
    return
  }
  func.func @transform_0(%arg0: i32) -> (i32, i32, i32) {
    %c0_i32 = arith.constant 0 : i32
    %c0_i32_0 = arith.constant 0 : i32
    %c0_i32_1 = arith.constant 0 : i32
    return %arg0, %c0_i32, %c0_i32_0 : i32, i32, i32
  }
  func.func @transform_1(%arg0: i32) -> (i32, i32, i32) {
    %c0_i32 = arith.constant 0 : i32
    %c0_i32_0 = arith.constant 0 : i32
    %c0_i32_1 = arith.constant 0 : i32
    %c0_i32_2 = arith.constant 0 : i32
    return %c0_i32, %c0_i32_0, %c0_i32_1 : i32, i32, i32
  }
  func.func @transform_2(%arg0: i32) -> (i32, i32, i32) {
    %c0_i32 = arith.constant 0 : i32
    %c0_i32_0 = arith.constant 0 : i32
    %c0_i32_1 = arith.constant 0 : i32
    %c0_i32_2 = arith.constant 0 : i32
    return %c0_i32, %c0_i32_0, %c0_i32_1 : i32, i32, i32
  }
  func.func @transform_3(%arg0: i32) -> (i32, i32) {
    %c0_i32 = arith.constant 0 : i32
    %c0_i32_0 = arith.constant 0 : i32
    %c0_i32_1 = arith.constant 0 : i32
    return %c0_i32, %c0_i32_0 : i32, i32
  }
  func.func @transform_4(%arg0: i32) -> (i32, i32) {
    %c0_i32 = arith.constant 0 : i32
    %c0_i32_0 = arith.constant 0 : i32
    %c0_i32_1 = arith.constant 0 : i32
    return %c0_i32, %c0_i32_0 : i32, i32
  }
  func.func @transform_5(%arg0: i32) -> (i32, i32) {
    %c0_i32 = arith.constant 0 : i32
    %c0_i32_0 = arith.constant 0 : i32
    %c0_i32_1 = arith.constant 0 : i32
    return %c0_i32, %c0_i32_0 : i32, i32
  }
  func.func @transform_6(%arg0: i32) -> (i32, i32, i32) {
    %c0_i32 = arith.constant 0 : i32
    %c0_i32_0 = arith.constant 0 : i32
    %c0_i32_1 = arith.constant 0 : i32
    return %arg0, %c0_i32, %c0_i32_0 : i32, i32, i32
  }
}

module attributes {stable_mosaic.version = 11 : i64} {
  func.func @_fc3_kernel(%arg0: i32, %arg1: memref<2x400xf32, #tpu.memory_space<vmem>>, %arg2: memref<400x128xf32, #tpu.memory_space<vmem>>, %arg3: memref<1x128xf32, #tpu.memory_space<vmem>>, %arg4: memref<128x128xf32, #tpu.memory_space<vmem>>, %arg5: memref<1x128xf32, #tpu.memory_space<vmem>>, %arg6: memref<128x128xf32, #tpu.memory_space<vmem>>, %arg7: memref<1x128xf32, #tpu.memory_space<vmem>>, %arg8: memref<2x128xf32, #tpu.memory_space<vmem>>) attributes {dimension_semantics = [#tpu.dimension_semantics<parallel>], iteration_bounds = array<i64: 1>, scalar_prefetch = 0 : i64, scratch_operands = 0 : i64, tpu.core_type = #tpu.core_type<tc>, window_params = [{transform_indices = @transform_0, window_bounds = array<i64: 2, 400>}, {pipeline_mode = #tpu.pipeline_mode<synchronous>, transform_indices = @transform_1, window_bounds = array<i64: 400, 128>}, {pipeline_mode = #tpu.pipeline_mode<synchronous>, transform_indices = @transform_2, window_bounds = array<i64: 1, 128>}, {pipeline_mode = #tpu.pipeline_mode<synchronous>, transform_indices = @transform_3, window_bounds = array<i64: 128, 128>}, {pipeline_mode = #tpu.pipeline_mode<synchronous>, transform_indices = @transform_4, window_bounds = array<i64: 1, 128>}, {pipeline_mode = #tpu.pipeline_mode<synchronous>, transform_indices = @transform_5, window_bounds = array<i64: 128, 128>}, {pipeline_mode = #tpu.pipeline_mode<synchronous>, transform_indices = @transform_6, window_bounds = array<i64: 1, 128>}, {transform_indices = @transform_7, window_bounds = array<i64: 2, 128>}]} {
    %c0 = arith.constant 0 : index
    %c0_0 = arith.constant 0 : index
    %0 = vector.load %arg1[%c0, %c0_0] : memref<2x400xf32, #tpu.memory_space<vmem>>, vector<2x400xf32>
    %c0_1 = arith.constant 0 : index
    %c0_2 = arith.constant 0 : index
    %1 = vector.load %arg2[%c0_1, %c0_2] : memref<400x128xf32, #tpu.memory_space<vmem>>, vector<400x128xf32>
    %cst = arith.constant dense<0.000000e+00> : vector<2x128xf32>
    %2 = tpu.matmul %0, %1, %cst {dimension_numbers = #tpu.dot_dimension_numbers<[1], [0], [0], [1], [0, 0, 1, 1], [], []>} : vector<2x400xf32>, vector<400x128xf32>, vector<2x128xf32> -> vector<2x128xf32>
    %c0_3 = arith.constant 0 : index
    %c0_4 = arith.constant 0 : index
    %3 = vector.load %arg3[%c0_3, %c0_4] : memref<1x128xf32, #tpu.memory_space<vmem>>, vector<1x128xf32>
    %4 = vector.broadcast %3 : vector<1x128xf32> to vector<2x128xf32>
    %5 = arith.addf %2, %4 : vector<2x128xf32>
    %cst_5 = arith.constant 0.000000e+00 : f32
    %6 = vector.broadcast %cst_5 : f32 to vector<2x128xf32>
    %7 = arith.maximumf %5, %6 : vector<2x128xf32>
    %c0_6 = arith.constant 0 : index
    %c0_7 = arith.constant 0 : index
    %8 = vector.load %arg4[%c0_6, %c0_7] : memref<128x128xf32, #tpu.memory_space<vmem>>, vector<128x128xf32>
    %cst_8 = arith.constant dense<0.000000e+00> : vector<2x128xf32>
    %9 = tpu.matmul %7, %8, %cst_8 {dimension_numbers = #tpu.dot_dimension_numbers<[1], [0], [0], [1], [0, 0, 1, 1], [], []>} : vector<2x128xf32>, vector<128x128xf32>, vector<2x128xf32> -> vector<2x128xf32>
    %c0_9 = arith.constant 0 : index
    %c0_10 = arith.constant 0 : index
    %10 = vector.load %arg5[%c0_9, %c0_10] : memref<1x128xf32, #tpu.memory_space<vmem>>, vector<1x128xf32>
    %11 = vector.broadcast %10 : vector<1x128xf32> to vector<2x128xf32>
    %12 = arith.addf %9, %11 : vector<2x128xf32>
    %cst_11 = arith.constant 0.000000e+00 : f32
    %13 = vector.broadcast %cst_11 : f32 to vector<2x128xf32>
    %14 = arith.maximumf %12, %13 : vector<2x128xf32>
    %c0_12 = arith.constant 0 : index
    %c0_13 = arith.constant 0 : index
    %15 = vector.load %arg6[%c0_12, %c0_13] : memref<128x128xf32, #tpu.memory_space<vmem>>, vector<128x128xf32>
    %cst_14 = arith.constant dense<0.000000e+00> : vector<2x128xf32>
    %16 = tpu.matmul %14, %15, %cst_14 {dimension_numbers = #tpu.dot_dimension_numbers<[1], [0], [0], [1], [0, 0, 1, 1], [], []>} : vector<2x128xf32>, vector<128x128xf32>, vector<2x128xf32> -> vector<2x128xf32>
    %c0_15 = arith.constant 0 : index
    %c0_16 = arith.constant 0 : index
    %17 = vector.load %arg7[%c0_15, %c0_16] : memref<1x128xf32, #tpu.memory_space<vmem>>, vector<1x128xf32>
    %18 = vector.broadcast %17 : vector<1x128xf32> to vector<2x128xf32>
    %19 = arith.addf %16, %18 : vector<2x128xf32>
    %c0_17 = arith.constant 0 : index
    %c0_18 = arith.constant 0 : index
    %20 = vector.load %arg8[%c0_17, %c0_18] : memref<2x128xf32, #tpu.memory_space<vmem>>, vector<2x128xf32>
    tpu.vector_store %arg8[%c0_17, %c0_18], %19 {strides = array<i32>} : memref<2x128xf32, #tpu.memory_space<vmem>>, vector<2x128xf32>,
    return
  }
  func.func @transform_0(%arg0: i32) -> (i32, i32) {
    %c0_i32 = arith.constant 0 : i32
    %c0_i32_0 = arith.constant 0 : i32
    return %arg0, %c0_i32 : i32, i32
  }
  func.func @transform_1(%arg0: i32) -> (i32, i32) {
    %c0_i32 = arith.constant 0 : i32
    %c0_i32_0 = arith.constant 0 : i32
    %c0_i32_1 = arith.constant 0 : i32
    return %c0_i32, %c0_i32_0 : i32, i32
  }
  func.func @transform_2(%arg0: i32) -> (i32, i32) {
    %c0_i32 = arith.constant 0 : i32
    %c0_i32_0 = arith.constant 0 : i32
    %c0_i32_1 = arith.constant 0 : i32
    return %c0_i32, %c0_i32_0 : i32, i32
  }
  func.func @transform_3(%arg0: i32) -> (i32, i32) {
    %c0_i32 = arith.constant 0 : i32
    %c0_i32_0 = arith.constant 0 : i32
    %c0_i32_1 = arith.constant 0 : i32
    return %c0_i32, %c0_i32_0 : i32, i32
  }
  func.func @transform_4(%arg0: i32) -> (i32, i32) {
    %c0_i32 = arith.constant 0 : i32
    %c0_i32_0 = arith.constant 0 : i32
    %c0_i32_1 = arith.constant 0 : i32
    return %c0_i32, %c0_i32_0 : i32, i32
  }
  func.func @transform_5(%arg0: i32) -> (i32, i32) {
    %c0_i32 = arith.constant 0 : i32
    %c0_i32_0 = arith.constant 0 : i32
    %c0_i32_1 = arith.constant 0 : i32
    return %c0_i32, %c0_i32_0 : i32, i32
  }
  func.func @transform_6(%arg0: i32) -> (i32, i32) {
    %c0_i32 = arith.constant 0 : i32
    %c0_i32_0 = arith.constant 0 : i32
    %c0_i32_1 = arith.constant 0 : i32
    return %c0_i32, %c0_i32_0 : i32, i32
  }
  func.func @transform_7(%arg0: i32) -> (i32, i32) {
    %c0_i32 = arith.constant 0 : i32
    %c0_i32_0 = arith.constant 0 : i32
    return %arg0, %c0_i32 : i32, i32
  }
}

</mosaic_0001>

<bundles_post_ra>
// kernel: lenet_forward.5
= control target key start
LH: loop header
LB: loop body
LE: loop exit
PB: predicated region body
PF: predicated region fallthrough
CT: control target
= control target key end

     0   :  { %v732_v4 = vmov 0.0|0.0   ;;  %v733_v26 = vmov 1983009808   ;;  %v90_v28 = vlaneseq  ;;  %vm106_vm0 = vcmask 130048   ;;  %s1072_s0 = inlined_call_operand.vmem [shape: f32[2,400], index: 0, kind: input, shape index: {}]   ;;  %s1073_s1 = inlined_call_operand.vmem [shape: f32[400,128], index: 1, kind: input, shape index: {}]   ;;  %s1074_s2 = inlined_call_operand.vmem [shape: f32[1,128], index: 2, kind: input, shape index: {}]   ;;  %s1075_s3 = inlined_call_operand.vmem [shape: f32[128,128], index: 3, kind: input, shape index: {}]   ;;  %s1076_s4 = inlined_call_operand.vmem [shape: f32[1,128], index: 4, kind: input, shape index: {}]   ;;  %s1077_s5 = inlined_call_operand.vmem [shape: f32[128,128], index: 5, kind: input, shape index: {}]   ;;  %s1078_s6 = inlined_call_operand.vmem [shape: f32[1,128], index: 6, kind: input, shape index: {}]   ;;  %s1079_s7 = inlined_call_operand.hbm [shape: f32[2,128], index: 7, kind: output, shape index: {}]  }
   0x1   :  { %v44_v0 = vld [vmem:[%s1073_s1 + $0x80] sm:$0xff]  ;;  %v45_v1 = vld [vmem:[%s1073_s1 + $0x88] sm:$0xff]  ;;  %627 = vmatprep.subr.bf16.mxu1 %v732_v4  ;;  %v46_v10 = vld [vmem:[%s1073_s1 + $0x90] sm:$0xff]  ;;  %v88_v27 = vunpack.c.l.s4 %v733_v26 }
   0x2   :  { %v28_v2 = vld [vmem:[%s1073_s1] sm:$0xff]  ;;  %v595_v3 = vpack.c.bf16 %v45_v1, %v44_v0  ;;  %v29_v5 = vld [vmem:[%s1073_s1 + $0x8] sm:$0xff]  ;;  %v47_v11 = vld [vmem:[%s1073_s1 + $0x98] sm:$0xff]  ;;  %v91_v39 = vshrl.u32 %v90_v28, 7 }
   0x3   :  { %v60_v6 = vld [vmem:[%s1073_s1 + $0x100] sm:$0xff]  ;;  %v61_v7 = vld [vmem:[%s1073_s1 + $0x108] sm:$0xff]  ;;  %v597_v8 = vpack.c.bf16 %v29_v5, %v28_v2  ;;  %v30_v12 = vld [vmem:[%s1073_s1 + $0x10] sm:$0xff]  ;;  %v599_v13 = vpack.c.bf16 %v47_v11, %v46_v10  ;;  %v89_v38 = vunpack.c.0.s8 %v88_v27 }
   0x4   :  { %v628_v9 = vpack.c.bf16 %v61_v7, %v60_v6  ;;  %596 = vmatprep.subr.bf16.mxu0 %v595_v3  ;;  %v31_v14 = vld [vmem:[%s1073_s1 + $0x18] sm:$0xff]  ;;  %v62_v15 = vld [vmem:[%s1073_s1 + $0x110] sm:$0xff]  ;;  %v48_v19 = vld [vmem:[%s1073_s1 + $0xa0] sm:$0xff] }
   0x5   :  { %v63_v16 = vld [vmem:[%s1073_s1 + $0x118] sm:$0xff]  ;;  %598 = vmatpush3.bf16.msra.mxu0 %v597_v8  ;;  %v601_v17 = vpack.c.bf16 %v31_v14, %v30_v12  ;;  %v49_v20 = vld [vmem:[%s1073_s1 + $0xa8] sm:$0xff]  ;;  %v32_v21 = vld [vmem:[%s1073_s1 + $0x20] sm:$0xff]  ;;  %v92_v49 = vsub.s32 %v89_v38, %v91_v39 }
   0x6   :  { %629 = vmatpush1.bf16.msra.mxu1 %v628_v9  ;;  %v631_v18 = vpack.c.bf16 %v63_v16, %v62_v15  ;;  %600 = vmatprep.subr.bf16.mxu0 %v599_v13  ;;  %v603_v22 = vpack.c.bf16 %v49_v20, %v48_v19  ;;  %v33_v23 = vld [vmem:[%s1073_s1 + $0x28] sm:$0xff]  ;;  %v64_v24 = vld [vmem:[%s1073_s1 + $0x120] sm:$0xff]  ;;  %v50_v29 = vld [vmem:[%s1073_s1 + $0xb0] sm:$0xff] }
   0x7   :  { %630 = vmatprep.subr.bf16.mxu1 %v732_v4  ;;  %v65_v25 = vld [vmem:[%s1073_s1 + $0x128] sm:$0xff]  ;;  %v51_v30 = vld [vmem:[%s1073_s1 + $0xb8] sm:$0xff]  ;;  %v605_v31 = vpack.c.bf16 %v33_v23, %v32_v21  ;;  %v34_v33 = vld [vmem:[%s1073_s1 + $0x30] sm:$0xff] }
   0x8   :  { %v634_v32 = vpack.c.bf16 %v65_v25, %v64_v24  ;;  %v607_v34 = vpack.c.bf16 %v51_v30, %v50_v29  ;;  %v35_v35 = vld [vmem:[%s1073_s1 + $0x38] sm:$0xff]  ;;  %v66_v36 = vld [vmem:[%s1073_s1 + $0x130] sm:$0xff]  ;;  %v52_v40 = vld [vmem:[%s1073_s1 + $0xc0] sm:$0xff] }
   0x9   :  { %602 = vmatpush3.bf16.msra.mxu0 %v601_v17  ;;  %v67_v37 = vld [vmem:[%s1073_s1 + $0x138] sm:$0xff]  ;;  %v53_v41 = vld [vmem:[%s1073_s1 + $0xc8] sm:$0xff]  ;;  %v609_v42 = vpack.c.bf16 %v35_v35, %v34_v33  ;;  %v36_v44 = vld [vmem:[%s1073_s1 + $0x40] sm:$0xff] }
   0xa   :  { %632 = vmatpush1.bf16.msra.mxu1 %v631_v18  ;;  %604 = vmatprep.subr.bf16.mxu0 %v603_v22  ;;  %v637_v43 = vpack.c.bf16 %v67_v37, %v66_v36  ;;  %v611_v45 = vpack.c.bf16 %v53_v41, %v52_v40  ;;  %v37_v46 = vld [vmem:[%s1073_s1 + $0x48] sm:$0xff]  ;;  %v68_v47 = vld [vmem:[%s1073_s1 + $0x140] sm:$0xff]  ;;  %v54_v50 = vld [vmem:[%s1073_s1 + $0xd0] sm:$0xff] }
   0xb   :  { %633 = vmatprep.subr.bf16.mxu1 %v732_v4  ;;  %v69_v48 = vld [vmem:[%s1073_s1 + $0x148] sm:$0xff]  ;;  %v55_v51 = vld [vmem:[%s1073_s1 + $0xd8] sm:$0xff]  ;;  %v613_v52 = vpack.c.bf16 %v37_v46, %v36_v44  ;;  %v38_v54 = vld [vmem:[%s1073_s1 + $0x50] sm:$0xff] }
   0xc   :  { %v640_v53 = vpack.c.bf16 %v69_v48, %v68_v47  ;;  %v27_v55 = vld [vmem:[%s1072_s0] sm:$0xff]  ;;  %v615_v56 = vpack.c.bf16 %v55_v51, %v54_v50  ;;  %v39_v57 = vld [vmem:[%s1073_s1 + $0x58] sm:$0xff]  ;;  %v70_v58 = vld [vmem:[%s1073_s1 + $0x150] sm:$0xff] }
   0xd   :  { %606 = vmatpush3.bf16.msra.mxu0 %v605_v31  ;;  %v71_v59 = vld [vmem:[%s1073_s1 + $0x158] sm:$0xff]  ;;  %v86_v60 = vcombine.high %v27_v55, %v27_v55  ;;  %v93_v61 = vrot.slane %v27_v55, %v92_v49  ;;  %v56_v62 = vld [vmem:[%s1073_s1 + $0xe0] sm:$0xff]  ;;  %v57_v63 = vld [vmem:[%s1073_s1 + $0xe8] sm:$0xff]  ;;  %v617_v2 = vpack.c.bf16 %v39_v57, %v38_v54 }
   0xe   :  { %635 = vmatpush1.bf16.msra.mxu1 %v634_v32  ;;  %608 = vmatprep.subr.bf16.mxu0 %v607_v34  ;;  %v643_v3 = vpack.c.bf16 %v71_v59, %v70_v58  ;;  %v40_v5 = vld [vmem:[%s1073_s1 + $0x60] sm:$0xff]  ;;  %v41_v6 = vld [vmem:[%s1073_s1 + $0x68] sm:$0xff]  ;;  %v619_v7 = vpack.c.bf16 %v57_v63, %v56_v62 }
   0xf   :  { %636 = vmatprep.subr.bf16.mxu1 %v732_v4  ;;  %v101_v0 = vcombine.high %v93_v61, %v93_v61  ;;  %v100_v1 = vrot.slane %v86_v60, %v92_v49  ;;  %v72_v8 = vld [vmem:[%s1073_s1 + $0x160] sm:$0xff]  ;;  %v73_v9 = vld [vmem:[%s1073_s1 + $0x168] sm:$0xff] }
  0x11   :  { %610 = vmatpush3.bf16.msra.mxu0 %v609_v42  ;;  %v102_v10 = vcombine.high %v100_v1, %v100_v1 }
  0x12   :  { %638 = vmatpush1.bf16.msra.mxu1 %v637_v43  ;;  %612 = vmatprep.subr.bf16.mxu0 %v611_v45 }
  0x13   :  { %639 = vmatprep.subr.bf16.mxu1 %v732_v4 }
  0x15   :  { %614 = vmatpush3.bf16.msra.mxu0 %v613_v52 }
  0x16   :  { %641 = vmatpush1.bf16.msra.mxu1 %v640_v53  ;;  %616 = vmatprep.subr.bf16.mxu0 %v615_v56 }
  0x17   :  { %642 = vmatprep.subr.bf16.mxu1 %v732_v4 }
  0x18   :  { %12 = vsyncpa [#allocation3], 0  ;;  %v58_v11 = vld [vmem:[%s1073_s1 + $0xf0] sm:$0xff]  ;;  %v59_v12 = vld [vmem:[%s1073_s1 + $0xf8] sm:$0xff]  ;;  %173 = vmatprep.mubr.f32.mxu0 %v101_v0  ;;  %453 = vmatprep.mubr.msk.f32.mxu1 %vm106_vm0, %v102_v10  ;;  %v621_v13 = vpack.c.bf16 %v41_v6, %v40_v5  ;;  %v646_v14 = vpack.c.bf16 %v73_v9, %v72_v8  ;;  %vm734_vm1 = vmmov 0   ;;  %v735_v49 = vmov 0.0  }
  0x19   :  { %618 = vmatpush3.bf16.msra.mxu0 %v617_v2  ;;  %v42_v15 = vld [vmem:[%s1073_s1 + $0x70] sm:$0xff]  ;;  %v623_v16 = vpack.c.bf16 %v59_v12, %v58_v11  ;;  %v43_v17 = vld [vmem:[%s1073_s1 + $0x78] sm:$0xff]  ;;  %v76_v22 = vld [vmem:[%s1073_s1 + $0x180] sm:$0xff]  ;;  %s736_s25 = smov [#allocation2]  }
  0x1a   :  { %644 = vmatpush1.bf16.msra.mxu1 %v643_v3  ;;  %620 = vmatprep.subr.bf16.mxu0 %v619_v7  ;;  %v74_v18 = vld [vmem:[%s1073_s1 + $0x170] sm:$0xff]  ;;  %v75_v19 = vld [vmem:[%s1073_s1 + $0x178] sm:$0xff]  ;;  %v625_v20 = vpack.c.bf16 %v43_v17, %v42_v15  ;;  %v77_v23 = vld [vmem:[%s1073_s1 + $0x188] sm:$0xff]  ;;  %s444_s26 = sshll.u32 %s736_s25, 4  ;;  %s445_s26 = int_to_ptr.vmem [resolvable:$true] %s444_s26 }
  0x1b   :  { %645 = vmatprep.subr.bf16.mxu1 %v732_v4  ;;  %v649_v21 = vpack.c.bf16 %v75_v19, %v74_v18  ;;  %v250_v24 = vld [vmem:[%s1075_s3] sm:$0xff]  ;;  %v251_v25 = vld [vmem:[%s1075_s3 + $0x8] sm:$0xff]  ;;  %v652_v26 = vpack.c.bf16 %v77_v23, %v76_v22  ;;  %v252_v28 = vld [vmem:[%s1075_s3 + $0x10] sm:$0xff]  ;;  %p713_p1 = scmp.lt.s32.totalorder %s445_s26, %s445_s26 }
  0x1c   :  { %v655_v27 = vpack.c.bf16 %v251_v25, %v250_v24  ;;  %v253_v29 = vld [vmem:[%s1075_s3 + $0x18] sm:$0xff]  ;;  %v254_v31 = vld [vmem:[%s1075_s3 + $0x20] sm:$0xff]  ;;  %v255_v32 = vld [vmem:[%s1075_s3 + $0x28] sm:$0xff] }
  0x1d   :  { %622 = vmatpush3.bf16.msra.mxu0 %v621_v13  ;;  %v658_v30 = vpack.c.bf16 %v253_v29, %v252_v28  ;;  %v661_v33 = vpack.c.bf16 %v255_v32, %v254_v31  ;;  %v256_v34 = vld [vmem:[%s1075_s3 + $0x30] sm:$0xff]  ;;  %v257_v35 = vld [vmem:[%s1075_s3 + $0x38] sm:$0xff]  ;;  %v258_v37 = vld [vmem:[%s1075_s3 + $0x40] sm:$0xff] }
  0x1e   :  { %647 = vmatpush1.bf16.msra.mxu1 %v646_v14  ;;  %624 = vmatprep.subr.bf16.mxu0 %v623_v16  ;;  %v664_v36 = vpack.c.bf16 %v257_v35, %v256_v34  ;;  %v259_v38 = vld [vmem:[%s1075_s3 + $0x48] sm:$0xff]  ;;  %v260_v40 = vld [vmem:[%s1075_s3 + $0x50] sm:$0xff]  ;;  %v261_v41 = vld [vmem:[%s1075_s3 + $0x58] sm:$0xff] }
  0x1f   :  { %648 = vmatprep.subr.bf16.mxu1 %v732_v4  ;;  %v667_v39 = vpack.c.bf16 %v259_v38, %v258_v37  ;;  %v670_v42 = vpack.c.bf16 %v261_v41, %v260_v40  ;;  %v262_v43 = vld [vmem:[%s1075_s3 + $0x60] sm:$0xff]  ;;  %v263_v44 = vld [vmem:[%s1075_s3 + $0x68] sm:$0xff]  ;;  %v264_v46 = vld [vmem:[%s1075_s3 + $0x70] sm:$0xff] }
  0x20   :  { %v673_v45 = vpack.c.bf16 %v263_v44, %v262_v43  ;;  %v265_v47 = vld [vmem:[%s1075_s3 + $0x78] sm:$0xff]  ;;  %v344_v50 = vld [vmem:[%s1077_s5] sm:$0xff]  ;;  %v345_v51 = vld [vmem:[%s1077_s5 + $0x8] sm:$0xff] }
  0x21   :  { %626 = vmatpush3.bf16.msra.mxu0 %v625_v20  ;;  %v676_v48 = vpack.c.bf16 %v265_v47, %v264_v46  ;;  %v346_v52 = vld [vmem:[%s1077_s5 + $0x10] sm:$0xff]  ;;  %v679_v53 = vpack.c.bf16 %v345_v51, %v344_v50  ;;  %v347_v54 = vld [vmem:[%s1077_s5 + $0x18] sm:$0xff]  ;;  %v348_v56 = vld [vmem:[%s1077_s5 + $0x20] sm:$0xff] }
  0x22   :  { %650 = vmatpush1.bf16.msra.mxu1 %v649_v21  ;;  %654 = vmatprep.subr.bf16.mxu0 %v732_v4  ;;  %v682_v55 = vpack.c.bf16 %v347_v54, %v346_v52  ;;  %v349_v57 = vld [vmem:[%s1077_s5 + $0x28] sm:$0xff]  ;;  %v350_v59 = vld [vmem:[%s1077_s5 + $0x30] sm:$0xff]  ;;  %v351_v60 = vld [vmem:[%s1077_s5 + $0x38] sm:$0xff] }
  0x23   :  { %651 = vmatprep.subr.bf16.mxu1 %v732_v4  ;;  %v685_v58 = vpack.c.bf16 %v349_v57, %v348_v56  ;;  %v352_v62 = vld [vmem:[%s1077_s5 + $0x40] sm:$0xff]  ;;  %v353_v63 = vld [vmem:[%s1077_s5 + $0x48] sm:$0xff]  ;;  %v355_v2 = vld [vmem:[%s1077_s5 + $0x58] sm:$0xff] }
  0x24   :  { %174 = vmatmul.mubr.f32.vlgmr.msra.gmra.mrb[0].mxu0 %v93_v61  ;;  %v688_v61 = vpack.c.bf16 %v351_v60, %v350_v59  ;;  %v691_v0 = vpack.c.bf16 %v353_v63, %v352_v62  ;;  %v356_v5 = vld [vmem:[%s1077_s5 + $0x60] sm:$0xff]  ;;  %v357_v6 = vld [vmem:[%s1077_s5 + $0x68] sm:$0xff]  ;;  %v358_v17 = vld [vmem:[%s1077_s5 + $0x70] sm:$0xff] }
  0x25   :  { %656 = vmatpush3.bf16.msra.mxu0 %v655_v27  ;;  %557 = vmatprep.mubr.msk.f32.mxu0 %vm734_vm1, %v735_v49  ;;  %v697_v7 = vpack.c.bf16 %v357_v6, %v356_v5  ;;  %v452_v10 = vld [vmem:[%s1074_s2] ss:$0 sm:$0xff] }
  0x26   :  { %653 = vmatpush1.bf16.msra.mxu1 %v652_v26  ;;  %657 = vmatprep.subr.bf16.mxu0 %v732_v4  ;;  %v454_v19 = vld [vmem:[%s1076_s4] ss:$0 sm:$0xff] }
  0x27   :  { %678 = vmatprep.subr.bf16.mxu1 %v732_v4  ;;  %v455_v24 = vld [vmem:[%s1078_s6] ss:$0 sm:$0xff] }
  0x29   :  { %244 = vmatmul.mubr.f32.vlgmr.msra.gmra.mrb[0].mxu1 %v100_v1  ;;  %659 = vmatpush3.bf16.msra.mxu0 %v658_v30  ;;  %v354_v1 = vld [vmem:[%s1077_s5 + $0x50] sm:$0xff] }
  0x2a   :  { %660 = vmatprep.subr.bf16.mxu0 %v732_v4  ;;  %592 = vmatprep.mubr.msk.f32.mxu1 %vm734_vm1, %v735_v49  ;;  %v694_v3 = vpack.c.bf16 %v355_v2, %v354_v1 }
  0x2b   :  { %680 = vmatpush3.bf16.msra.mxu1 %v679_v53 }
  0x2c   :  { %681 = vmatprep.subr.bf16.mxu1 %v732_v4 }
  0x2d   :  { %662 = vmatpush3.bf16.msra.mxu0 %v661_v33 }
  0x2e   :  { %663 = vmatprep.subr.bf16.mxu0 %v732_v4 }
  0x2f   :  { %683 = vmatpush3.bf16.msra.mxu1 %v682_v55 }
  0x30   :  { %684 = vmatprep.subr.bf16.mxu1 %v732_v4 }
  0x31   :  { %665 = vmatpush3.bf16.msra.mxu0 %v664_v36 }
  0x32   :  { %666 = vmatprep.subr.bf16.mxu0 %v732_v4 }
  0x33   :  { %686 = vmatpush3.bf16.msra.mxu1 %v685_v58 }
  0x34   :  { %687 = vmatprep.subr.bf16.mxu1 %v732_v4 }
  0x35   :  { %668 = vmatpush3.bf16.msra.mxu0 %v667_v39 }
  0x36   :  { %669 = vmatprep.subr.bf16.mxu0 %v732_v4 }
  0x37   :  { %689 = vmatpush3.bf16.msra.mxu1 %v688_v61 }
  0x38   :  { %690 = vmatprep.subr.bf16.mxu1 %v732_v4 }
  0x39   :  { %671 = vmatpush3.bf16.msra.mxu0 %v670_v42 }
  0x3a   :  { %672 = vmatprep.subr.bf16.mxu0 %v732_v4 }
  0x3b   :  { %692 = vmatpush3.bf16.msra.mxu1 %v691_v0 }
  0x3c   :  { %693 = vmatprep.subr.bf16.mxu1 %v732_v4 }
  0x3d   :  { %674 = vmatpush3.bf16.msra.mxu0 %v673_v45 }
  0x3e   :  { %675 = vmatprep.subr.bf16.mxu0 %v732_v4 }
  0x3f   :  { %695 = vmatpush3.bf16.msra.mxu1 %v694_v3 }
  0x40   :  { %696 = vmatprep.subr.bf16.mxu1 %v732_v4 }
  0x41   :  { %677 = vmatpush3.bf16.msra.mxu0 %v676_v48 }
  0x43   :  { %698 = vmatpush3.bf16.msra.mxu1 %v697_v7 }
  0x44   :  { %699 = vmatprep.subr.bf16.mxu1 %v732_v4  ;;  %v359_v4 = vld [vmem:[%s1077_s5 + $0x78] sm:$0xff]  ;;  %s708_s5 = scalar_lea.vmem %s445_s26, 32 }
  0x45   :  { %v700_v18 = vpack.c.bf16 %v359_v4, %v358_v17  ;;  %p709_p0 = scmp.ne.s32.totalorder %s445_s26, %s708_s5  ;;  %p714_p2 = scmp.lt.s32.totalorder %s708_s5, %s708_s5 }
  0x47   :  { %701 = vmatpush3.bf16.msra.mxu1 %v700_v18  ;;  %p715_p3 = por %p714_p2, %p713_p1 }
  0x49   :  { %p716_p4 = pnand %p715_p3, %p709_p0 }
  0xf7   :  { %v488_v8 = vpop.f32.mrb[0].mxu0 }
  0xf8   :  { %v489_v9 = vpop.f32.mrb[1].mxu0 }
  0xf9   :  { %v490_v11 = vadd.f32 %v489_v9, %v488_v8 }
  0xfb   :  { %v176_v12 = vadd.f32 %v490_v11, %v452_v10 }
  0xfc   :  { %v245_v13 = vpop.f32.mrb[0].mxu1 }
  0xfd   :  { %v247_v14 = vpop.f32.mrb[1].mxu1  ;;  %v246_v15 = vadd.f32 %v245_v13, %v176_v12 }
  0xff   :  { %v249_v16 = vmax.f32 %v246_v15, 0.0 }
 0x101   :  { %558 = vmatmul.mubr.f32.vlgmr.msra.gmra.mrb[2].mxu0 %v249_v16 }
 0x1d4   :  { %v339_v20 = vpop.f32.mrb[2].mxu0 }
 0x1d5   :  { %v340_v21 = vadd.f32 %v454_v19, %v339_v20  ;;  %v559_v22 = vpop.f32.mrb[3].mxu0 }
 0x1d7   :  { %v343_v23 = vmax.f32 %v340_v21, 0.0 }
 0x1d9   :  { %593 = vmatmul.mubr.f32.vlgmr.msra.gmra.mrb[2].mxu1 %v343_v23 }
 0x2ac   :  { %v433_v25 = vpop.f32.mrb[2].mxu1 }
 0x2ad   :  { %v434_v26 = vadd.f32 %v455_v24, %v433_v25  ;;  %v594_v27 = vpop.f32.mrb[3].mxu1 }
 0x2af   :  { %437 = vst [vmem:[#allocation2] sm:$0x3] %v434_v26 }
 0x2b0   :  { %719 = shalt.err (!%p716_p4)
}
 0x2b1   :  { %s720_s28 = scalar_lea.hbm %s1079_s7, 32 }
 0x2b2   :  { %p721_p5 = scmp.ne.s32.totalorder %s1079_s7, %s720_s28  ;;  %p724_p6 = scmp.lt.u32.totalorder %s720_s28, %s1079_s7 }
 0x2b4   :  { %p726_p7 = pnand %p724_p6, %p721_p5 }
 0x2b6   :  { %729 = shalt.err (!%p726_p7)
}
 0x2b7   :  { %447 = dma.vmem_to_hbm [thread:$0]  %s445_s26, 32, %s1079_s7, [#allocation3]  }
 0x2b8   :  { %730 = dma.done.wait [#allocation3], 32  }
 0x2b9   :  { %731 = vsyncadd [#allocation3], 4294967264 }
 0x2ba   :  { %451 = vsyncpa [#allocation3], 1 }

// kernel: lenet_forward.3
= control target key start
LH: loop header
LB: loop body
LE: loop exit
PB: predicated region body
PF: predicated region fallthrough
CT: control target
= control target key end

     0   :  { %11 = vsyncpa [#allocation3], 0  ;;  %s2618_s21 = smov 0   ;;  %s2939_s0 = inlined_call_operand.vmem [shape: f32[2,32,96], index: 0, kind: input, shape index: {}]   ;;  %s2940_s1 = inlined_call_operand.vmem [shape: f32[5,96,112], index: 1, kind: input, shape index: {}]   ;;  %s2941_s2 = inlined_call_operand.hbm [shape: f32[5,96,112], index: 2, kind: input, shape index: {}]   ;;  %s2942_s3 = inlined_call_operand.vmem [shape: f32[1,112], index: 3, kind: input, shape index: {}]   ;;  %s2943_s4 = inlined_call_operand.vmem [shape: f32[14,28], index: 4, kind: input, shape index: {}]   ;;  %s2944_s5 = inlined_call_operand.vmem [shape: f32[14,28], index: 5, kind: input, shape index: {}]   ;;  %s2945_s6 = inlined_call_operand.vmem [shape: f32[2,14,112], index: 6, kind: output, shape index: {}]  }
   0x1 LB: > { %s2624_s22 = sadd.s32 4294967295, %s2577_s21   ;;  %p1623_p0 = scmp.ge.s32.totalorder %s2577_s21, 1  ;;  %s2577_s21 = sphi %s2618_s21, %s17_s21  }
   0x2   : > { %p179_p1 = scmp.lt.s32.totalorder %s2577_s21, 3  ;;  %s2579_s23 = smov [#allocation2]  }
   0x3   : > { %s194_s24 = sshll.u32 %s2579_s23, 4  ;;  %p2946_p3 = scmp.eq.s32.totalorder %s2624_s22, 0  ;;  %s195_s24 = int_to_ptr.vmem [resolvable:$true] %s194_s24 }
   0x4   : > { %p2628_p2 = pnand %p1623_p0, %p179_p1  ;;  %s2539_s29 = scalar_lea.hbm %s2941_s2, 7680 }
   0x5   : > { %p2540_p6 = scmp.ne.s32.totalorder %s2941_s2, %s2539_s29  ;;  %p2546_p10 = scmp.lt.u32.totalorder %s2539_s29, %s2941_s2 }
   0x6   : > { %s2948_s25 = scalar_select %p2628_p2, 1, 0 }
   0x7   : > { %p2521_p4 = pneg %p2628_p2 }
   0x9   : > { %p2637_p5 = pnand %p2946_p3, %p2521_p4 }
   0xb   : > { %p2541_p7 = pneg %p2637_p5 }
   0xd   : > { %p2542_p8 = pnand %p2541_p7, %p2540_p6 }
   0xf   : > { %p2543_p9 = pneg %p2542_p8 }
  0x11   : > { %p2548_p11 = pnand %p2546_p10, %p2543_p9 }
  0x13   : > { %2551 = shalt.err (!%p2548_p11)
}
  0x14   : > { %s2552_s10 = scalar_lea.vmem %s195_s24, 7680  ;;  %p2560_p1 = scmp.lt.s32.totalorder %s195_s24, %s195_s24 }
  0x15   : > { %p2553_p12 = scmp.ne.s32.totalorder %s195_s24, %s2552_s10  ;;  %p2561_p4 = scmp.lt.s32.totalorder %s2552_s10, %s2552_s10 }
  0x17   : > { %p2555_p13 = pnand %p2553_p12, %p2541_p7  ;;  %p2562_p3 = por %p2561_p4, %p2560_p1 }
  0x19   : > { %p2556_p0 = pneg %p2555_p13 }
  0x1b   : > { %p2563_p2 = pnand %p2562_p3, %p2556_p0 }
  0x1d   : > { %2566 = shalt.err (!%p2563_p2)
}
  0x1e   : > { %s2580_s11 = smov 128   ;;  %s2581_s12 = smov 8  }
  0x1f   : > { %2524 = dma.hbm_to_vmem [thread:$0]  (!%p2637_p5), %s2941_s2, 7680, %s195_s24, [#allocation3], %s2580_s11, %s2580_s11, %s2581_s12  }
  0x20   : > { %p2950_p6 = scmp.ne.s32.totalorder %s2948_s25, 0 }
  0x21   : > { %p2951_p8 = scmp.eq.s32.totalorder (!%p2950_p6), %s2624_s22, 0 }
  0x22   : > { %227 = sbr.rel (%p2950_p6) target bundleno = 611 (0x263), region = 44 }
  0x29   : > { %2572 = dma.done.wait (%p2951_p8), [#allocation3], 7680   ;;  %p2952_p7 = pmov %p2951_p8 }
  0x2a   : > { %p257_p2 = scmp.lt.s32.totalorder %s2624_s22, 1  ;;  %v1632_v0 = vld [vmem:[%s2940_s1 + $0x60] sm:$0xff]  ;;  %v1633_v1 = vld [vmem:[%s2940_s1 + $0x68] sm:$0xff]  ;;  %v1634_v5 = vld [vmem:[%s2940_s1 + $0x70] sm:$0xff]  ;;  %vm312_vm0 = vcmask 785408   ;;  %vm1379_vm1 = vcmask 228352  }
  0x2b   : > { %2574 = vsyncadd (%p2952_p7), [#allocation3], 4294959616  ;;  %v508_v2 = vld [vmem:[#allocation2 + $0x60] sm:$0xff]  ;;  %v2225_v3 = vpack.c.bf16 %v1633_v1, %v1632_v0  ;;  %v509_v4 = vld [vmem:[#allocation2 + $0x68] sm:$0xff]  ;;  %vm1386_vm2 = vcmask 1043456   ;;  %vm2582_vm3 = vmmov 1  }
  0x2c   : > { %s2954_s22 = smov (!%p257_p2, %s2624_s22), 1  ;;  %v1635_v6 = vld [vmem:[%s2940_s1 + $0x78] sm:$0xff]  ;;  %v2273_v7 = vpack.c.bf16 %v509_v4, %v508_v2  ;;  %v510_v9 = vld [vmem:[#allocation2 + $0x70] sm:$0xff]  ;;  %v1636_v11 = vld [vmem:[%s2940_s1 + $0x80] sm:$0xff]  ;;  %vm1552_vm5 = vcmask 914432   ;;  %vm1550_vm6 = vcmask 916480  }
  0x2d   : > { %v2229_v8 = vpack.c.bf16 %v1635_v6, %v1634_v5  ;;  %v511_v10 = vld [vmem:[#allocation2 + $0x78] sm:$0xff]  ;;  %s1729_s27 = sshll.u32 %s2954_s22, 5  ;;  %2226 = vmatprep.subr.bf16.mxu0 %v2225_v3  ;;  %v1637_v13 = vld [vmem:[%s2940_s1 + $0x88] sm:$0xff]  ;;  %v512_v14 = vld [vmem:[#allocation2 + $0x80] sm:$0xff]  ;;  %s1730_s23 = sshll.u32 %s2954_s22, 4 }
  0x2e   : > { %v2277_v12 = vpack.c.bf16 %v511_v10, %v510_v9  ;;  %v513_v15 = vld [vmem:[#allocation2 + $0x88] sm:$0xff]  ;;  %2274 = vmatprep.subr.bf16.mxu1 %v2273_v7  ;;  %2228 = vmatpush3.bf16.msra.mxu0 %v2225_v3  ;;  %v2233_v16 = vpack.c.bf16 %v1637_v13, %v1636_v11  ;;  %s2689_s8 = scalar_lea.vmem %s2939_s0, %s1729_s27  ;;  %v1638_v18 = vld [vmem:[%s2940_s1 + $0x90] sm:$0xff]  ;;  %v1639_v19 = vld [vmem:[%s2940_s1 + $0x98] sm:$0xff]  ;;  %s266_s26 = scalar_lea.vmem %s2945_s6, %s1730_s23 }
  0x2f   : > { %2276 = vmatpush3.bf16.msra.mxu1 %v2273_v7  ;;  %2230 = vmatprep.subr.bf16.mxu0 %v2229_v8  ;;  %v2281_v17 = vpack.c.bf16 %v513_v15, %v512_v14  ;;  %v514_v20 = vld [vmem:[#allocation2 + $0x90] sm:$0xff]  ;;  %v515_v21 = vld [vmem:[#allocation2 + $0x98] sm:$0xff]  ;;  %v295_v22 = vld [vmem:[%s2689_s8 + $0x1] sm:$0xff]  ;;  %v2237_v23 = vpack.c.bf16 %v1639_v19, %v1638_v18 }
  0x30   : > { %2278 = vmatprep.subr.bf16.mxu1 %v2277_v12  ;;  %v2285_v24 = vpack.c.bf16 %v515_v21, %v514_v20  ;;  %v1640_v25 = vld [vmem:[%s2940_s1 + $0xa0] sm:$0xff]  ;;  %v1641_v26 = vld [vmem:[%s2940_s1 + $0xa8] sm:$0xff]  ;;  %1927 = vmatprep.mubr.msk.f32.mxu0 %vm312_vm0, %v295_v22  ;;  %v1642_v31 = vld [vmem:[%s2940_s1 + $0xb0] sm:$0xff] }
  0x31   : > { %v516_v27 = vld [vmem:[#allocation2 + $0xa0] sm:$0xff]  ;;  %v517_v28 = vld [vmem:[#allocation2 + $0xa8] sm:$0xff]  ;;  %1987 = vmatprep.mubr.msk.f32.mxu1 %vm312_vm0, %v295_v22  ;;  %v2241_v29 = vpack.c.bf16 %v1641_v26, %v1640_v25  ;;  %v1643_v32 = vld [vmem:[%s2940_s1 + $0xb8] sm:$0xff] }
  0x32   : > { %2232 = vmatpush3.bf16.msra.mxu0 %v2229_v8  ;;  %v2289_v30 = vpack.c.bf16 %v517_v28, %v516_v27  ;;  %v518_v33 = vld [vmem:[#allocation2 + $0xb0] sm:$0xff]  ;;  %v519_v34 = vld [vmem:[#allocation2 + $0xb8] sm:$0xff]  ;;  %v2245_v35 = vpack.c.bf16 %v1643_v32, %v1642_v31  ;;  %v271_v37 = vld [vmem:[%s2940_s1] sm:$0xff] }
  0x33   : > { %2280 = vmatpush3.bf16.msra.mxu1 %v2277_v12  ;;  %2234 = vmatprep.subr.bf16.mxu0 %v2233_v16  ;;  %v2293_v36 = vpack.c.bf16 %v519_v34, %v518_v33  ;;  %v272_v38 = vld [vmem:[%s2940_s1 + $0x8] sm:$0xff]  ;;  %v283_v39 = vld [vmem:[#allocation2] sm:$0xff]  ;;  %v273_v43 = vld [vmem:[%s2940_s1 + $0x10] sm:$0xff] }
  0x34   : > { %2282 = vmatprep.subr.bf16.mxu1 %v2281_v17  ;;  %v284_v40 = vld [vmem:[#allocation2 + $0x8] sm:$0xff]  ;;  %v2249_v41 = vpack.c.bf16 %v272_v38, %v271_v37  ;;  %v274_v44 = vld [vmem:[%s2940_s1 + $0x18] sm:$0xff]  ;;  %v285_v45 = vld [vmem:[#allocation2 + $0x10] sm:$0xff] }
  0x35   : > { %v2297_v42 = vpack.c.bf16 %v284_v40, %v283_v39  ;;  %v286_v46 = vld [vmem:[#allocation2 + $0x18] sm:$0xff]  ;;  %v296_v47 = vld [vmem:[%s2689_s8 + $0x9] sm:$0xff]  ;;  %v2253_v48 = vpack.c.bf16 %v274_v44, %v273_v43  ;;  %v275_v50 = vld [vmem:[%s2940_s1 + $0x20] sm:$0xff] }
  0x36   : > { %2236 = vmatpush3.bf16.msra.mxu0 %v2233_v16  ;;  %v2301_v49 = vpack.c.bf16 %v286_v46, %v285_v45  ;;  %v276_v51 = vld [vmem:[%s2940_s1 + $0x28] sm:$0xff]  ;;  %v287_v52 = vld [vmem:[#allocation2 + $0x20] sm:$0xff]  ;;  %v297_v54 = vld [vmem:[%s2689_s8 + $0x11] sm:$0xff] }
  0x37   : > { %2284 = vmatpush3.bf16.msra.mxu1 %v2281_v17  ;;  %2238 = vmatprep.subr.bf16.mxu0 %v2237_v23  ;;  %v288_v53 = vld [vmem:[#allocation2 + $0x28] sm:$0xff]  ;;  %v298_v55 = vld [vmem:[%s2689_s8 + $0x19] sm:$0xf]  ;;  %v2257_v56 = vpack.c.bf16 %v276_v51, %v275_v50  ;;  %v277_v58 = vld [vmem:[%s2940_s1 + $0x30] sm:$0xff] }
  0x38   : > { %2286 = vmatprep.subr.bf16.mxu1 %v2285_v24  ;;  %v2305_v57 = vpack.c.bf16 %v288_v53, %v287_v52  ;;  %v278_v59 = vld [vmem:[%s2940_s1 + $0x38] sm:$0xff]  ;;  %v289_v60 = vld [vmem:[#allocation2 + $0x30] sm:$0xff]  ;;  %v267_v62 = vld [vmem:[%s2689_s8] sm:$0xff] }
  0x39   : > { %v290_v61 = vld [vmem:[#allocation2 + $0x38] sm:$0xff]  ;;  %v2261_v63 = vpack.c.bf16 %v278_v59, %v277_v58  ;;  %v279_v1 = vld [vmem:[%s2940_s1 + $0x40] sm:$0xff]  ;;  %v280_v2 = vld [vmem:[%s2940_s1 + $0x48] sm:$0xff] }
  0x3a   : > { %2240 = vmatpush3.bf16.msra.mxu0 %v2237_v23  ;;  %v2309_v0 = vpack.c.bf16 %v290_v61, %v289_v60  ;;  %v291_v3 = vld [vmem:[#allocation2 + $0x40] sm:$0xff]  ;;  %v292_v4 = vld [vmem:[#allocation2 + $0x48] sm:$0xff]  ;;  %v2265_v5 = vpack.c.bf16 %v280_v2, %v279_v1  ;;  %v281_v7 = vld [vmem:[%s2940_s1 + $0x50] sm:$0xff] }
  0x3b   : > { %2288 = vmatpush3.bf16.msra.mxu1 %v2285_v24  ;;  %2242 = vmatprep.subr.bf16.mxu0 %v2241_v29  ;;  %v2313_v6 = vpack.c.bf16 %v292_v4, %v291_v3  ;;  %v282_v8 = vld [vmem:[%s2940_s1 + $0x58] sm:$0xff]  ;;  %v293_v9 = vld [vmem:[#allocation2 + $0x50] sm:$0xff]  ;;  %v1660_v13 = vld [vmem:[%s2940_s1 + $0xc0] sm:$0xff] }
  0x3c   : > { %2290 = vmatprep.subr.bf16.mxu1 %v2289_v30  ;;  %v294_v10 = vld [vmem:[#allocation2 + $0x58] sm:$0xff]  ;;  %v2269_v11 = vpack.c.bf16 %v282_v8, %v281_v7  ;;  %v1661_v14 = vld [vmem:[%s2940_s1 + $0xc8] sm:$0xff]  ;;  %v809_v15 = vld [vmem:[#allocation2 + $0xc0] sm:$0xff] }
  0x3d   : > { %v2317_v12 = vpack.c.bf16 %v294_v10, %v293_v9  ;;  %v810_v16 = vld [vmem:[#allocation2 + $0xc8] sm:$0xff]  ;;  %v2321_v17 = vpack.c.bf16 %v1661_v14, %v1660_v13  ;;  %v1662_v19 = vld [vmem:[%s2940_s1 + $0xd0] sm:$0xff]  ;;  %v1663_v20 = vld [vmem:[%s2940_s1 + $0xd8] sm:$0xff] }
  0x3e   : > { %2244 = vmatpush3.bf16.msra.mxu0 %v2241_v29  ;;  %v2345_v18 = vpack.c.bf16 %v810_v16, %v809_v15  ;;  %v811_v21 = vld [vmem:[#allocation2 + $0xd0] sm:$0xff]  ;;  %v812_v22 = vld [vmem:[#allocation2 + $0xd8] sm:$0xff]  ;;  %v268_v23 = vld [vmem:[%s2689_s8 + $0x8] sm:$0xff]  ;;  %v2325_v24 = vpack.c.bf16 %v1663_v20, %v1662_v19 }
  0x3f   : > { %2292 = vmatpush3.bf16.msra.mxu1 %v2289_v30  ;;  %2246 = vmatprep.subr.bf16.mxu0 %v2245_v35  ;;  %v2349_v25 = vpack.c.bf16 %v812_v22, %v811_v21  ;;  %v1664_v26 = vld [vmem:[%s2940_s1 + $0xe0] sm:$0xff]  ;;  %v1665_v27 = vld [vmem:[%s2940_s1 + $0xe8] sm:$0xff]  ;;  %v269_v30 = vld [vmem:[%s2689_s8 + $0x10] sm:$0xff] }
  0x40   : > { %2294 = vmatprep.subr.bf16.mxu1 %v2293_v36  ;;  %v813_v28 = vld [vmem:[#allocation2 + $0xe0] sm:$0xff]  ;;  %v814_v29 = vld [vmem:[#allocation2 + $0xe8] sm:$0xff]  ;;  %v270_v31 = vld [vmem:[%s2689_s8 + $0x18] sm:$0xf]  ;;  %v2329_v32 = vpack.c.bf16 %v1665_v27, %v1664_v26 }
  0x41   : > { %v2353_v33 = vpack.c.bf16 %v814_v29, %v813_v28  ;;  %v1666_v34 = vld [vmem:[%s2940_s1 + $0xf0] sm:$0xff]  ;;  %v816_v37 = vld [vmem:[#allocation2 + $0xf8] sm:$0xff]  ;;  %v690_v38 = vld [vmem:[%s2689_s8 + $0x2] sm:$0xff] }
  0x42   : > { %2248 = vmatpush3.bf16.msra.mxu0 %v2245_v35  ;;  %v1667_v35 = vld [vmem:[%s2940_s1 + $0xf8] sm:$0xff]  ;;  %v817_v43 = vld [vmem:[#allocation2 + $0x100] sm:$0xff]  ;;  %v818_v44 = vld [vmem:[#allocation2 + $0x108] sm:$0xff] }
  0x43   : > { %2296 = vmatpush3.bf16.msra.mxu1 %v2293_v36  ;;  %2250 = vmatprep.subr.bf16.mxu0 %v2249_v41  ;;  %v815_v36 = vld [vmem:[#allocation2 + $0xf0] sm:$0xff]  ;;  %v2333_v39 = vpack.c.bf16 %v1667_v35, %v1666_v34  ;;  %v2361_v46 = vpack.c.bf16 %v818_v44, %v817_v43  ;;  %v820_v50 = vld [vmem:[#allocation2 + $0x118] sm:$0xff]  ;;  %v1680_v53 = vld [vmem:[%s2940_s1 + $0x120] sm:$0xff] }
  0x44   : > { %2298 = vmatprep.subr.bf16.mxu1 %v2297_v42  ;;  %v2357_v40 = vpack.c.bf16 %v816_v37, %v815_v36  ;;  %v1682_v59 = vld [vmem:[%s2940_s1 + $0x130] sm:$0xff]  ;;  %v1683_v60 = vld [vmem:[%s2940_s1 + $0x138] sm:$0xff]  ;;  %v1684_v2 = vld [vmem:[%s2940_s1 + $0x140] sm:$0xff] }
  0x45   : > { %1928 = vmatmul.mubr.msk.f32.vlgmr.msra.gmra.mrb[0].mxu0 %vm312_vm0, %v296_v47  ;;  %v1031_v61 = vld [vmem:[#allocation2 + $0x130] sm:$0xff]  ;;  %v1685_v3 = vld [vmem:[%s2940_s1 + $0x148] sm:$0xff]  ;;  %v1033_v4 = vld [vmem:[#allocation2 + $0x140] sm:$0xff] }
  0x46   : > { %2252 = vmatpush3.bf16.msra.mxu0 %v2249_v41  ;;  %1988 = vmatmul.mubr.msk.f32.vlgmr.msra.gmra.mrb[0].mxu1 %vm312_vm0, %v296_v47  ;;  %v1668_v41 = vld [vmem:[%s2940_s1 + $0x100] sm:$0xff]  ;;  %v1670_v47 = vld [vmem:[%s2940_s1 + $0x110] sm:$0xff]  ;;  %v693_v7 = vld [vmem:[%s2689_s8 + $0x1a] sm:$0xf]  ;;  %v2377_v8 = vpack.c.bf16 %v1685_v3, %v1684_v2 }
  0x47   : > { %2300 = vmatpush3.bf16.msra.mxu1 %v2297_v42  ;;  %2254 = vmatprep.subr.bf16.mxu0 %v2253_v48  ;;  %v1669_v42 = vld [vmem:[%s2940_s1 + $0x108] sm:$0xff]  ;;  %v1686_v10 = vld [vmem:[%s2940_s1 + $0x150] sm:$0xff]  ;;  %v1036_v13 = vld [vmem:[#allocation2 + $0x158] sm:$0xff] }
  0x48   : > { %2302 = vmatprep.subr.bf16.mxu1 %v2301_v49  ;;  %1930 = vmatprep.mubr.msk.f32.mxu0 %vm312_vm0, %v297_v54  ;;  %v2337_v45 = vpack.c.bf16 %v1669_v42, %v1668_v41  ;;  %v910_v14 = vld [vmem:[%s2689_s8 + $0x3] sm:$0xff]  ;;  %v1040_v26 = vld [vmem:[#allocation2 + $0x178] sm:$0xff]  ;;  %v1702_v35 = vld [vmem:[%s2940_s1 + $0x190] sm:$0xff] }
  0x49   : > { %1990 = vmatprep.mubr.msk.f32.mxu1 %vm312_vm0, %v297_v54  ;;  %1931 = vmatmul.mubr.msk.f32.gmra.mrb[2].mxu0 %vm312_vm0, %v298_v55  ;;  %v1681_v54 = vld [vmem:[%s2940_s1 + $0x128] sm:$0xff]  ;;  %v1037_v19 = vld [vmem:[#allocation2 + $0x160] sm:$0xff]  ;;  %v1703_v36 = vld [vmem:[%s2940_s1 + $0x198] sm:$0xff] }
  0x4a   : > { %2256 = vmatpush3.bf16.msra.mxu0 %v2253_v48  ;;  %1991 = vmatmul.mubr.msk.f32.gmra.mrb[2].mxu1 %vm312_vm0, %v298_v55  ;;  %v1671_v48 = vld [vmem:[%s2940_s1 + $0x118] sm:$0xff]  ;;  %v1029_v55 = vld [vmem:[#allocation2 + $0x120] sm:$0xff]  ;;  %v1038_v20 = vld [vmem:[#allocation2 + $0x168] sm:$0xff] }
  0x4b   : > { %2304 = vmatpush3.bf16.msra.mxu1 %v2301_v49  ;;  %2258 = vmatprep.subr.bf16.mxu0 %v2257_v56  ;;  %v819_v49 = vld [vmem:[#allocation2 + $0x110] sm:$0xff]  ;;  %v2341_v51 = vpack.c.bf16 %v1671_v48, %v1670_v47  ;;  %v2409_v22 = vpack.c.bf16 %v1038_v20, %v1037_v19  ;;  %v1700_v29 = vld [vmem:[%s2940_s1 + $0x180] sm:$0xff]  ;;  %v1705_v43 = vld [vmem:[%s2940_s1 + $0x1a8] sm:$0xff] }
  0x4c   : > { %2306 = vmatprep.subr.bf16.mxu1 %v2305_v57  ;;  %1957 = vmatprep.mubr.msk.f32.mxu0 %vm312_vm0, %v267_v62  ;;  %v2365_v52 = vpack.c.bf16 %v820_v50, %v819_v49  ;;  %v1251_v37 = vld [vmem:[#allocation2 + $0x190] sm:$0xff]  ;;  %v1704_v42 = vld [vmem:[%s2940_s1 + $0x1a0] sm:$0xff]  ;;  %v913_v47 = vld [vmem:[%s2689_s8 + $0x1b] sm:$0xf] }
  0x4d   : > { %2017 = vmatprep.mubr.msk.f32.mxu1 %vm312_vm0, %v267_v62  ;;  %v1032_v62 = vld [vmem:[#allocation2 + $0x138] sm:$0xff]  ;;  %v1253_v44 = vld [vmem:[#allocation2 + $0x1a0] sm:$0xff]  ;;  %v2425_v48 = vpack.c.bf16 %v1705_v43, %v1704_v42  ;;  %v1706_v50 = vld [vmem:[%s2940_s1 + $0x1b0] sm:$0xff] }
  0x4e   : > { %2260 = vmatpush3.bf16.msra.mxu0 %v2257_v56  ;;  %v1030_v56 = vld [vmem:[#allocation2 + $0x128] sm:$0xff]  ;;  %v2397_v1 = vpack.c.bf16 %v1032_v62, %v1031_v61  ;;  %v1260_v2 = vld [vmem:[#allocation2 + $0x1d8] sm:$0xff]  ;;  %vm2470_vm4 = vmpackc.low %vm1386_vm2, %vm2582_vm3 }
  0x4f   : > { %2308 = vmatpush3.bf16.msra.mxu1 %v2305_v57  ;;  %2262 = vmatprep.subr.bf16.mxu0 %v2261_v63  ;;  %v2369_v57 = vpack.c.bf16 %v1681_v54, %v1680_v53  ;;  %v2393_v58 = vpack.c.bf16 %v1030_v56, %v1029_v55  ;;  %v1256_v53 = vld [vmem:[#allocation2 + $0x1b8] sm:$0xff]  ;;  %v1130_v54 = vld [vmem:[%s2689_s8 + $0x4] sm:$0xff] }
  0x50   : > { %2310 = vmatprep.subr.bf16.mxu1 %v2309_v0  ;;  %v1466_v42 = vld [vmem:[%s2944_s5 + $0x8] sm:$0x3f] }
  0x52   : > { %2264 = vmatpush3.bf16.msra.mxu0 %v2261_v63  ;;  %v691_v63 = vld [vmem:[%s2689_s8 + $0xa] sm:$0xff] }
  0x53   : > { %2312 = vmatpush3.bf16.msra.mxu1 %v2309_v0  ;;  %2266 = vmatprep.subr.bf16.mxu0 %v2265_v5  ;;  %v2373_v0 = vpack.c.bf16 %v1683_v60, %v1682_v59  ;;  %v1257_v59 = vld [vmem:[#allocation2 + $0x1c0] sm:$0xff]  ;;  %v1258_v60 = vld [vmem:[#allocation2 + $0x1c8] sm:$0xff] }
  0x54   : > { %2314 = vmatprep.subr.bf16.mxu1 %v2313_v6  ;;  %v2457_v62 = vpack.c.bf16 %v1258_v60, %v1257_v59 }
  0x56   : > { %2268 = vmatpush3.bf16.msra.mxu0 %v2265_v5  ;;  %v1034_v5 = vld [vmem:[#allocation2 + $0x148] sm:$0xff] }
  0x57   : > { %2316 = vmatpush3.bf16.msra.mxu1 %v2313_v6  ;;  %2270 = vmatprep.subr.bf16.mxu0 %v2269_v11  ;;  %v692_v6 = vld [vmem:[%s2689_s8 + $0x12] sm:$0xff]  ;;  %v2401_v9 = vpack.c.bf16 %v1034_v5, %v1033_v4 }
  0x58   : > { %2318 = vmatprep.subr.bf16.mxu1 %v2317_v12  ;;  %v1131_v5 = vld [vmem:[%s2689_s8 + $0xc] sm:$0xff] }
  0x5a   : > { %2272 = vmatpush3.bf16.msra.mxu0 %v2269_v11  ;;  %v1687_v11 = vld [vmem:[%s2940_s1 + $0x158] sm:$0xff] }
  0x5b   : > { %2320 = vmatpush3.bf16.msra.mxu1 %v2317_v12  ;;  %2322 = vmatprep.subr.bf16.mxu0 %v2321_v17  ;;  %v1035_v12 = vld [vmem:[#allocation2 + $0x150] sm:$0xff]  ;;  %v2381_v15 = vpack.c.bf16 %v1687_v11, %v1686_v10  ;;  %v1720_v10 = vld [vmem:[%s2942_s3] ss:$0 sm:$0xff] }
  0x5c   : > { %2346 = vmatprep.subr.bf16.mxu1 %v2345_v18  ;;  %v2405_v16 = vpack.c.bf16 %v1036_v13, %v1035_v12 }
  0x5d   : > { %1958 = vmatmul.mubr.msk.f32.vlgmr.msra.gmra.mrb[0].mxu0 %vm312_vm0, %v268_v23 }
  0x5e   : > { %2018 = vmatmul.mubr.msk.f32.vlgmr.msra.gmra.mrb[0].mxu1 %vm312_vm0, %v268_v23  ;;  %2324 = vmatpush3.bf16.msra.mxu0 %v2321_v17  ;;  %v1688_v17 = vld [vmem:[%s2940_s1 + $0x160] sm:$0xff]  ;;  %v1690_v23 = vld [vmem:[%s2940_s1 + $0x170] sm:$0xff] }
  0x5f   : > { %2348 = vmatpush3.bf16.msra.mxu1 %v2345_v18  ;;  %2326 = vmatprep.subr.bf16.mxu0 %v2325_v24  ;;  %v1689_v18 = vld [vmem:[%s2940_s1 + $0x168] sm:$0xff] }
  0x60   : > { %2350 = vmatprep.subr.bf16.mxu1 %v2349_v25  ;;  %1960 = vmatprep.mubr.msk.f32.mxu0 %vm312_vm0, %v269_v30  ;;  %v2385_v21 = vpack.c.bf16 %v1689_v18, %v1688_v17 }
  0x61   : > { %2020 = vmatprep.mubr.msk.f32.mxu1 %vm312_vm0, %v269_v30  ;;  %1961 = vmatmul.mubr.msk.f32.gmra.mrb[2].mxu0 %vm312_vm0, %v270_v31  ;;  %v1701_v30 = vld [vmem:[%s2940_s1 + $0x188] sm:$0xff] }
  0x62   : > { %2328 = vmatpush3.bf16.msra.mxu0 %v2325_v24  ;;  %2021 = vmatmul.mubr.msk.f32.gmra.mrb[2].mxu1 %vm312_vm0, %v270_v31  ;;  %v1691_v24 = vld [vmem:[%s2940_s1 + $0x178] sm:$0xff]  ;;  %v1249_v31 = vld [vmem:[#allocation2 + $0x180] sm:$0xff] }
  0x63   : > { %2352 = vmatpush3.bf16.msra.mxu1 %v2349_v25  ;;  %2330 = vmatprep.subr.bf16.mxu0 %v2329_v32  ;;  %v1039_v25 = vld [vmem:[#allocation2 + $0x170] sm:$0xff]  ;;  %v2389_v27 = vpack.c.bf16 %v1691_v24, %v1690_v23 }
  0x64   : > { %2354 = vmatprep.subr.bf16.mxu1 %v2353_v33  ;;  %2047 = vmatprep.mubr.msk.f32.mxu0 %vm312_vm0, %v690_v38  ;;  %v2413_v28 = vpack.c.bf16 %v1040_v26, %v1039_v25 }
  0x65   : > { %2077 = vmatprep.mubr.msk.f32.mxu1 %vm312_vm0, %v690_v38  ;;  %v1252_v38 = vld [vmem:[#allocation2 + $0x198] sm:$0xff] }
  0x66   : > { %2332 = vmatpush3.bf16.msra.mxu0 %v2329_v32  ;;  %v1250_v32 = vld [vmem:[#allocation2 + $0x188] sm:$0xff]  ;;  %v2445_v41 = vpack.c.bf16 %v1252_v38, %v1251_v37 }
  0x67   : > { %2356 = vmatpush3.bf16.msra.mxu1 %v2353_v33  ;;  %2334 = vmatprep.subr.bf16.mxu0 %v2333_v39  ;;  %v2417_v33 = vpack.c.bf16 %v1701_v30, %v1700_v29  ;;  %v2441_v34 = vpack.c.bf16 %v1250_v32, %v1249_v31 }
  0x68   : > { %2358 = vmatprep.subr.bf16.mxu1 %v2357_v40 }
  0x6a   : > { %2336 = vmatpush3.bf16.msra.mxu0 %v2333_v39  ;;  %v911_v39 = vld [vmem:[%s2689_s8 + $0xb] sm:$0xff] }
  0x6b   : > { %2360 = vmatpush3.bf16.msra.mxu1 %v2357_v40  ;;  %2338 = vmatprep.subr.bf16.mxu0 %v2337_v45  ;;  %v2421_v40 = vpack.c.bf16 %v1703_v36, %v1702_v35 }
  0x6c   : > { %2362 = vmatprep.subr.bf16.mxu1 %v2361_v46 }
  0x6e   : > { %2340 = vmatpush3.bf16.msra.mxu0 %v2337_v45  ;;  %v1254_v45 = vld [vmem:[#allocation2 + $0x1a8] sm:$0xff] }
  0x6f   : > { %2364 = vmatpush3.bf16.msra.mxu1 %v2361_v46  ;;  %2342 = vmatprep.subr.bf16.mxu0 %v2341_v51  ;;  %v912_v46 = vld [vmem:[%s2689_s8 + $0x13] sm:$0xff]  ;;  %v2449_v49 = vpack.c.bf16 %v1254_v45, %v1253_v44 }
  0x70   : > { %2366 = vmatprep.subr.bf16.mxu1 %v2365_v52 }
  0x72   : > { %2344 = vmatpush3.bf16.msra.mxu0 %v2341_v51  ;;  %v1707_v51 = vld [vmem:[%s2940_s1 + $0x1b8] sm:$0xff] }
  0x73   : > { %2368 = vmatpush3.bf16.msra.mxu1 %v2365_v52  ;;  %2370 = vmatprep.subr.bf16.mxu0 %v2369_v57  ;;  %v1255_v52 = vld [vmem:[#allocation2 + $0x1b0] sm:$0xff]  ;;  %v2429_v55 = vpack.c.bf16 %v1707_v51, %v1706_v50 }
  0x74   : > { %2394 = vmatprep.subr.bf16.mxu1 %v2393_v58  ;;  %v2453_v56 = vpack.c.bf16 %v1256_v53, %v1255_v52 }
  0x75   : > { %2048 = vmatmul.mubr.msk.f32.vlgmr.msra.gmra.mrb[0].mxu0 %vm312_vm0, %v691_v63 }
  0x76   : > { %2078 = vmatmul.mubr.msk.f32.vlgmr.msra.gmra.mrb[0].mxu1 %vm312_vm0, %v691_v63  ;;  %2372 = vmatpush3.bf16.msra.mxu0 %v2369_v57  ;;  %v1708_v57 = vld [vmem:[%s2940_s1 + $0x1c0] sm:$0xff]  ;;  %v1710_v63 = vld [vmem:[%s2940_s1 + $0x1d0] sm:$0xff] }
  0x77   : > { %2396 = vmatpush3.bf16.msra.mxu1 %v2393_v58  ;;  %2374 = vmatprep.subr.bf16.mxu0 %v2373_v0  ;;  %v1709_v58 = vld [vmem:[%s2940_s1 + $0x1c8] sm:$0xff] }
  0x78   : > { %2398 = vmatprep.subr.bf16.mxu1 %v2397_v1  ;;  %2050 = vmatprep.mubr.msk.f32.mxu0 %vm312_vm0, %v692_v6  ;;  %v2433_v61 = vpack.c.bf16 %v1709_v58, %v1708_v57 }
  0x79   : > { %2080 = vmatprep.mubr.msk.f32.mxu1 %vm312_vm0, %v692_v6  ;;  %2051 = vmatmul.mubr.msk.f32.gmra.mrb[2].mxu0 %vm312_vm0, %v693_v7  ;;  %v1132_v6 = vld [vmem:[%s2689_s8 + $0x14] sm:$0xff] }
  0x7a   : > { %2376 = vmatpush3.bf16.msra.mxu0 %v2373_v0  ;;  %2081 = vmatmul.mubr.msk.f32.gmra.mrb[2].mxu1 %vm312_vm0, %v693_v7  ;;  %v1711_v0 = vld [vmem:[%s2940_s1 + $0x1d8] sm:$0xff] }
  0x7b   : > { %2400 = vmatpush3.bf16.msra.mxu1 %v2397_v1  ;;  %2378 = vmatprep.subr.bf16.mxu0 %v2377_v8  ;;  %v1259_v1 = vld [vmem:[#allocation2 + $0x1d0] sm:$0xff]  ;;  %v2437_v3 = vpack.c.bf16 %v1711_v0, %v1710_v63  ;;  %v1133_v7 = vld [vmem:[%s2689_s8 + $0x1c] sm:$0xf] }
  0x7c   : > { %2402 = vmatprep.subr.bf16.mxu1 %v2401_v9  ;;  %2107 = vmatprep.mubr.msk.f32.mxu0 %vm312_vm0, %v910_v14  ;;  %v2461_v4 = vpack.c.bf16 %v1260_v2, %v1259_v1 }
  0x7d   : > { %2137 = vmatprep.mubr.msk.f32.mxu1 %vm312_vm0, %v910_v14 }
  0x7e   : > { %2380 = vmatpush3.bf16.msra.mxu0 %v2377_v8  ;;  %v1377_v8 = vld [vmem:[%s2943_s4] sm:$0xff] }
  0x7f   : > { %2404 = vmatpush3.bf16.msra.mxu1 %v2401_v9  ;;  %2382 = vmatprep.subr.bf16.mxu0 %v2381_v15  ;;  %v1465_v9 = vld [vmem:[%s2944_s5] sm:$0xff] }
  0x80   : > { %2406 = vmatprep.subr.bf16.mxu1 %v2405_v16 }
  0x82   : > { %2384 = vmatpush3.bf16.msra.mxu0 %v2381_v15 }
  0x83   : > { %2408 = vmatpush3.bf16.msra.mxu1 %v2405_v16  ;;  %2386 = vmatprep.subr.bf16.mxu0 %v2385_v21 }
  0x84   : > { %2410 = vmatprep.subr.bf16.mxu1 %v2409_v22 }
  0x86   : > { %2388 = vmatpush3.bf16.msra.mxu0 %v2385_v21 }
  0x87   : > { %2412 = vmatpush3.bf16.msra.mxu1 %v2409_v22  ;;  %2390 = vmatprep.subr.bf16.mxu0 %v2389_v27 }
  0x88   : > { %2414 = vmatprep.subr.bf16.mxu1 %v2413_v28 }
  0x8a   : > { %2392 = vmatpush3.bf16.msra.mxu0 %v2389_v27 }
  0x8b   : > { %2416 = vmatpush3.bf16.msra.mxu1 %v2413_v28  ;;  %2418 = vmatprep.subr.bf16.mxu0 %v2417_v33 }
  0x8c   : > { %2442 = vmatprep.subr.bf16.mxu1 %v2441_v34 }
  0x8d   : > { %2108 = vmatmul.mubr.msk.f32.vlgmr.msra.gmra.mrb[0].mxu0 %vm312_vm0, %v911_v39 }
  0x8e   : > { %2138 = vmatmul.mubr.msk.f32.vlgmr.msra.gmra.mrb[0].mxu1 %vm312_vm0, %v911_v39  ;;  %2420 = vmatpush3.bf16.msra.mxu0 %v2417_v33 }
  0x8f   : > { %2444 = vmatpush3.bf16.msra.mxu1 %v2441_v34  ;;  %2422 = vmatprep.subr.bf16.mxu0 %v2421_v40 }
  0x90   : > { %2446 = vmatprep.subr.bf16.mxu1 %v2445_v41  ;;  %2110 = vmatprep.mubr.msk.f32.mxu0 %vm312_vm0, %v912_v46 }
  0x91   : > { %2140 = vmatprep.mubr.msk.f32.mxu1 %vm312_vm0, %v912_v46  ;;  %2111 = vmatmul.mubr.msk.f32.gmra.mrb[2].mxu0 %vm312_vm0, %v913_v47 }
  0x92   : > { %2424 = vmatpush3.bf16.msra.mxu0 %v2421_v40  ;;  %2141 = vmatmul.mubr.msk.f32.gmra.mrb[2].mxu1 %vm312_vm0, %v913_v47 }
  0x93   : > { %2448 = vmatpush3.bf16.msra.mxu1 %v2445_v41  ;;  %2426 = vmatprep.subr.bf16.mxu0 %v2425_v48  ;;  %v1378_v41 = vld [vmem:[%s2943_s4 + $0x8] sm:$0x3f] }
  0x94   : > { %2450 = vmatprep.subr.bf16.mxu1 %v2449_v49  ;;  %2167 = vmatprep.mubr.msk.f32.mxu0 %vm312_vm0, %v1130_v54 }
  0x95   : > { %2197 = vmatprep.mubr.msk.f32.mxu1 %vm312_vm0, %v1130_v54 }
  0x96   : > { %2428 = vmatpush3.bf16.msra.mxu0 %v2425_v48 }
  0x97   : > { %2452 = vmatpush3.bf16.msra.mxu1 %v2449_v49  ;;  %2430 = vmatprep.subr.bf16.mxu0 %v2429_v55 }
  0x98   : > { %2454 = vmatprep.subr.bf16.mxu1 %v2453_v56 }
  0x9a   : > { %2432 = vmatpush3.bf16.msra.mxu0 %v2429_v55 }
  0x9b   : > { %2456 = vmatpush3.bf16.msra.mxu1 %v2453_v56  ;;  %2434 = vmatprep.subr.bf16.mxu0 %v2433_v61 }
  0x9c   : > { %2458 = vmatprep.subr.bf16.mxu1 %v2457_v62 }
  0x9e   : > { %2436 = vmatpush3.bf16.msra.mxu0 %v2433_v61 }
  0x9f   : > { %2460 = vmatpush3.bf16.msra.mxu1 %v2457_v62  ;;  %2438 = vmatprep.subr.bf16.mxu0 %v2437_v3 }
  0xa0   : > { %2462 = vmatprep.subr.bf16.mxu1 %v2461_v4 }
  0xa2   : > { %2440 = vmatpush3.bf16.msra.mxu0 %v2437_v3 }
  0xa3   : > { %2464 = vmatpush3.bf16.msra.mxu1 %v2461_v4 }
  0xa5   : > { %2168 = vmatmul.mubr.msk.f32.vlgmr.msra.gmra.mrb[0].mxu0 %vm312_vm0, %v1131_v5 }
  0xa6   : > { %2198 = vmatmul.mubr.msk.f32.vlgmr.msra.gmra.mrb[0].mxu1 %vm312_vm0, %v1131_v5  ;;  %2170 = vmatprep.mubr.msk.f32.mxu0 %vm312_vm0, %v1132_v6 }
  0xa7   : > { %2200 = vmatprep.mubr.msk.f32.mxu1 %vm312_vm0, %v1132_v6 }
  0xa9   : > { %2171 = vmatmul.mubr.msk.f32.gmra.mrb[2].mxu0 %vm312_vm0, %v1133_v7 }
  0xaa   : > { %2201 = vmatmul.mubr.msk.f32.gmra.mrb[2].mxu1 %vm312_vm0, %v1133_v7  ;;  %2211 = vmatprep.mubr.msk.f32.mxu0 %vm1379_vm1, %v1377_v8 }
  0xab   : > { %2222 = vmatprep.mubr.msk.f32.mxu1 %vm1379_vm1, %v1465_v9 }
 0x178   : > { %v2169_v11 = vpop.f32.mrb[0].mxu0 }
 0x179   : > { %v1358_v12 = vadd.f32 %v2169_v11, %v1720_v10  ;;  %v2199_v13 = vpop.f32.mrb[0].mxu1  ;;  %v1225_v14 = vpop.f32.mrb[1].mxu0 }
 0x17a   : > { %v1366_v15 = vadd.f32 %v2199_v13, %v1720_v10  ;;  %v1357_v16 = vadd.f32 %v1720_v10, %v1225_v14  ;;  %v1327_v17 = vpop.f32.mrb[1].mxu1 }
 0x17b   : > { %v1362_v18 = vmax.f32 %v1358_v12, 0.0  ;;  %v1365_v19 = vadd.f32 %v1720_v10, %v1327_v17 }
 0x17c   : > { %v1370_v20 = vmax.f32 %v1366_v15, 0.0  ;;  %v1361_v21 = vmax.f32 %v1357_v16, 0.0  ;;  %v2172_v22 = vpop.f32.mrb[2].mxu0 }
 0x17d   : > { %v1369_v23 = vmax.f32 %v1365_v19, 0.0  ;;  %v1360_v24 = vadd.f32 %v2172_v22, %v1720_v10  ;;  %v2202_v25 = vpop.f32.mrb[2].mxu1  ;;  %v1235_v26 = vpop.f32.mrb[3].mxu0 }
 0x17e   : > { %v1374_v27 = vmax.f32 %v1362_v18, %v1370_v20  ;;  %v1368_v28 = vadd.f32 %v2202_v25, %v1720_v10  ;;  %v1359_v29 = vadd.f32 %v1720_v10, %v1235_v26  ;;  %v1337_v30 = vpop.f32.mrb[3].mxu1 }
 0x17f   : > { %v1373_v31 = vmax.f32 %v1361_v21, %v1369_v23  ;;  %v1364_v32 = vmax.f32 %v1360_v24, 0.0  ;;  %v1367_v33 = vadd.f32 %v1720_v10, %v1337_v30 }
 0x180   : > { %v1372_v34 = vmax.f32 %v1368_v28, 0.0  ;;  %v1363_v35 = vmax.f32 %v1359_v29, 0.0 }
 0x181   : > { %v2465_v36 = vpack.c.bf16 %v1374_v27, %v1373_v31  ;;  %v1371_v37 = vmax.f32 %v1367_v33, 0.0 }
 0x182   : > { %v1376_v38 = vmax.f32 %v1364_v32, %v1372_v34 }
 0x183   : > { %v1375_v39 = vmax.f32 %v1363_v35, %v1371_v37  ;;  %2466 = vmatprep.subr.bf16.mxu0 %v2465_v36  ;;  %2476 = vmatprep.subr.bf16.mxu1 %v2465_v36 }
 0x184   : > { %2468 = vmatpush3.bf16.msra.mxu0 %v2465_v36  ;;  %2478 = vmatpush3.bf16.msra.mxu1 %v2465_v36 }
 0x185   : > { %v2469_v40 = vpack.c.bf16 %v1376_v38, %v1375_v39 }
 0x187   : > { %2471 = vmatprep.subr.msk.bf16.mxu0 %vm2470_vm4, %v2469_v40  ;;  %2481 = vmatprep.subr.msk.bf16.mxu1 %vm2470_vm4, %v2469_v40 }
 0x188   : > { %2474 = vmatpush3.bf16.msk.msra.mxu0 %vm2470_vm4, %v2469_v40  ;;  %2484 = vmatpush3.bf16.msk.msra.mxu1 %vm2470_vm4, %v2469_v40 }
 0x18b   : > { %2212 = vmatmul.mubr.msk.f32.vlgmr.msra.gmra.mrb[4].mxu0 %vm1379_vm1, %v1378_v41  ;;  %2223 = vmatmul.mubr.msk.f32.vlgmr.msra.gmra.mrb[4].mxu1 %vm1379_vm1, %v1466_v42 }
 0x25e   : > { %v2213_v43 = vpop.f32.mrb[4].mxu0  ;;  %v2224_v44 = vpop.f32.mrb[4].mxu1 }
 0x25f   : > { %v1549_v45 = vmax.f32 %v2213_v43, %v2224_v44  ;;  %v1456_v46 = vpop.f32.mrb[5].mxu0  ;;  %v1539_v47 = vpop.f32.mrb[5].mxu1 }
 0x260   : > { %v1548_v48 = vmax.f32 %v1456_v46, %v1539_v47 }
 0x261   : > { %1553 = vst.msk [vmem:[%s266_s26 + $0x8] sm:$0x3f] %vm1552_vm5, %v1549_v45 }
 0x262   : > { %1551 = vst.msk [vmem:[%s266_s26] sm:$0xff] %vm1550_vm6, %v1548_v48 }
 0x263 PF: > { %s17_s21 = sadd.s32 1, %s2577_s21  }
 0x264   : > { %p14_p3 = scmp.ge.s32.totalorder %s17_s21, 4  }
 0x266   :  { %16 = sbr.rel (!%p14_p3) target bundleno = 1 (0x1), region = 87 }
 0x26d   :  { %1575 = vsyncpa [#allocation3], 1 }
 0x26e   :  { %1577 = vsyncpa [#allocation3 + $0x1], 1 }

// kernel: lenet_forward.4
= control target key start
LH: loop header
LB: loop body
LE: loop exit
PB: predicated region body
PF: predicated region fallthrough
CT: control target
= control target key end

     0   :  { %s2428_s21 = smov 0   ;;  %s2910_s0 = inlined_call_operand.vmem [shape: f32[2,14,112], index: 0, kind: input, shape index: {}]   ;;  %s2911_s1 = inlined_call_operand.vmem [shape: f32[5,112,80], index: 1, kind: input, shape index: {}]   ;;  %s2912_s2 = inlined_call_operand.vmem [shape: f32[5,112,80], index: 2, kind: input, shape index: {}]   ;;  %s2913_s3 = inlined_call_operand.vmem [shape: f32[1,80], index: 3, kind: input, shape index: {}]   ;;  %s2914_s4 = inlined_call_operand.vmem [shape: f32[5,10], index: 4, kind: input, shape index: {}]   ;;  %s2915_s5 = inlined_call_operand.vmem [shape: f32[5,10], index: 5, kind: input, shape index: {}]   ;;  %s2916_s6 = inlined_call_operand.vmem [shape: f32[2,5,80], index: 6, kind: output, shape index: {}]  }
   0x1 LB: > { %s1427_s22 = sadd.s32 4294967295, %s2387_s21   ;;  %p1431_p0 = scmp.ge.s32.totalorder %s2387_s21, 1  ;;  %s2387_s21 = sphi %s2428_s21, %s16_s21  }
   0x2   : > { %p212_p1 = scmp.lt.s32.totalorder %s2387_s21, 3 }
   0x4   : > { %p213_p2 = pnand %p1431_p0, %p212_p1 }
   0x5   : > { %v1435_v0 = vld [vmem:[%s2911_s1 + $0x70] sm:$0xff] (!%p213_p2)  ;;  %v1436_v1 = vld [vmem:[%s2911_s1 + $0x78] sm:$0xff] (!%p213_p2)  ;;  %p241_p3 = scmp.lt.s32.totalorder (!%p213_p2), %s1427_s22, 1  ;;  %v1437_v5 = vld [vmem:[%s2911_s1 + $0x80] sm:$0xff] (!%p213_p2)  ;;  %vm297_vm0 = vcmask (!%p213_p2), 916480   ;;  %vm2390_vm1 = vmmov (!%p213_p2), 0  }
   0x6   : > { %216 = sbr.rel (%p213_p2) target bundleno = 588 (0x24c), region = 44  ;;  %v1453_v2 = vld [vmem:[%s2912_s2 + $0x70] sm:$0xff] (!%p213_p2)  ;;  %v2065_v3 = vpack.c.bf16 (!%p213_p2), %v1436_v1, %v1435_v0  ;;  %v1454_v4 = vld [vmem:[%s2912_s2 + $0x78] sm:$0xff] (!%p213_p2)  ;;  %v1438_v6 = vld [vmem:[%s2911_s1 + $0x88] sm:$0xff] (!%p213_p2)  ;;  %vm1223_vm2 = vcmask (!%p213_p2), 1041408   ;;  %vm2392_vm3 = vmmov (!%p213_p2), 1  }
   0x7   : > { %v2121_v7 = vpack.c.bf16 (!%p213_p2), %v1454_v4, %v1453_v2  ;;  %v2069_v8 = vpack.c.bf16 (!%p213_p2), %v1438_v6, %v1437_v5  ;;  %v1455_v9 = vld [vmem:[%s2912_s2 + $0x80] sm:$0xff] (!%p213_p2)  ;;  %v1456_v10 = vld [vmem:[%s2912_s2 + $0x88] sm:$0xff] (!%p213_p2)  ;;  %v1439_v11 = vld [vmem:[%s2911_s1 + $0x90] sm:$0xff] (!%p213_p2)  ;;  %vm1219_vm5 = vcmask (!%p213_p2), 80896   ;;  %vm1372_vm6 = vcmask (!%p213_p2), 651264  }
   0x8   : > { %2066 = vmatprep.subr.bf16.mxu0 (!%p213_p2), %v2065_v3  ;;  %v2125_v12 = vpack.c.bf16 (!%p213_p2), %v1456_v10, %v1455_v9  ;;  %v1440_v13 = vld [vmem:[%s2911_s1 + $0x98] sm:$0xff] (!%p213_p2)  ;;  %v1457_v14 = vld [vmem:[%s2912_s2 + $0x90] sm:$0xff] (!%p213_p2)  ;;  %v1441_v18 = vld [vmem:[%s2911_s1 + $0xa0] sm:$0xff] (!%p213_p2) }
   0x9   : > { %v1458_v15 = vld [vmem:[%s2912_s2 + $0x98] sm:$0xff] (!%p213_p2)  ;;  %2122 = vmatprep.subr.bf16.mxu1 (!%p213_p2), %v2121_v7  ;;  %2068 = vmatpush3.bf16.msra.mxu0 (!%p213_p2), %v2065_v3  ;;  %v2073_v16 = vpack.c.bf16 (!%p213_p2), %v1440_v13, %v1439_v11  ;;  %v1442_v19 = vld [vmem:[%s2911_s1 + $0xa8] sm:$0xff] (!%p213_p2)  ;;  %v1459_v20 = vld [vmem:[%s2912_s2 + $0xa0] sm:$0xff] (!%p213_p2) }
   0xa   : > { %2124 = vmatpush3.bf16.msra.mxu1 (!%p213_p2), %v2121_v7  ;;  %2070 = vmatprep.subr.bf16.mxu0 (!%p213_p2), %v2069_v8  ;;  %v2129_v17 = vpack.c.bf16 (!%p213_p2), %v1458_v15, %v1457_v14  ;;  %v1460_v21 = vld [vmem:[%s2912_s2 + $0xa8] sm:$0xff] (!%p213_p2)  ;;  %v2077_v22 = vpack.c.bf16 (!%p213_p2), %v1442_v19, %v1441_v18  ;;  %v1443_v25 = vld [vmem:[%s2911_s1 + $0xb0] sm:$0xff] (!%p213_p2)  ;;  %v1444_v26 = vld [vmem:[%s2911_s1 + $0xb8] sm:$0xff] (!%p213_p2) }
   0xb   : > { %2126 = vmatprep.subr.bf16.mxu1 (!%p213_p2), %v2125_v12  ;;  %v2133_v24 = vpack.c.bf16 (!%p213_p2), %v1460_v21, %v1459_v20  ;;  %v1461_v27 = vld [vmem:[%s2912_s2 + $0xb0] sm:$0xff] (!%p213_p2)  ;;  %v1462_v28 = vld [vmem:[%s2912_s2 + $0xb8] sm:$0xff] (!%p213_p2)  ;;  %v2081_v29 = vpack.c.bf16 (!%p213_p2), %v1444_v26, %v1443_v25  ;;  %v1445_v31 = vld [vmem:[%s2911_s1 + $0xc0] sm:$0xff] (!%p213_p2) }
   0xc   : > { %v2137_v30 = vpack.c.bf16 (!%p213_p2), %v1462_v28, %v1461_v27  ;;  %v1446_v32 = vld [vmem:[%s2911_s1 + $0xc8] sm:$0xff] (!%p213_p2)  ;;  %v1463_v33 = vld [vmem:[%s2912_s2 + $0xc0] sm:$0xff] (!%p213_p2)  ;;  %v1447_v37 = vld [vmem:[%s2911_s1 + $0xd0] sm:$0xff] (!%p213_p2) }
   0xd   : > { %s2918_s22 = smov (!%p241_p3, %s1427_s22), 1  ;;  %2072 = vmatpush3.bf16.msra.mxu0 %v2069_v8  ;;  %v1464_v34 = vld [vmem:[%s2912_s2 + $0xc8] sm:$0xff]  ;;  %v2085_v35 = vpack.c.bf16 %v1446_v32, %v1445_v31  ;;  %v1448_v38 = vld [vmem:[%s2911_s1 + $0xd8] sm:$0xff]  ;;  %v1465_v39 = vld [vmem:[%s2912_s2 + $0xd0] sm:$0xff] }
   0xe   : > { %s1574_s25 = sshll.u32 %s2918_s22, 4  ;;  %2128 = vmatpush3.bf16.msra.mxu1 %v2125_v12  ;;  %2074 = vmatprep.subr.bf16.mxu0 %v2073_v16  ;;  %v2141_v36 = vpack.c.bf16 %v1464_v34, %v1463_v33  ;;  %v1466_v40 = vld [vmem:[%s2912_s2 + $0xd8] sm:$0xff]  ;;  %v2089_v41 = vpack.c.bf16 %v1448_v38, %v1447_v37  ;;  %v252_v43 = vld [vmem:[%s2911_s1] sm:$0xff]  ;;  %v253_v44 = vld [vmem:[%s2911_s1 + $0x8] sm:$0xff]  ;;  %s1434_s14 = sshll.u32 %s2918_s22, 3 }
   0xf   : > { %s2484_s8 = scalar_lea.vmem %s2910_s0, %s1574_s25  ;;  %2130 = vmatprep.subr.bf16.mxu1 %v2129_v17  ;;  %v2145_v42 = vpack.c.bf16 %v1466_v40, %v1465_v39  ;;  %v266_v45 = vld [vmem:[%s2912_s2] sm:$0xff]  ;;  %v267_v46 = vld [vmem:[%s2912_s2 + $0x8] sm:$0xff]  ;;  %v2093_v47 = vpack.c.bf16 %v253_v44, %v252_v43  ;;  %v254_v49 = vld [vmem:[%s2911_s1 + $0x10] sm:$0xff]  ;;  %s249_s17 = scalar_lea.vmem %s2916_s6, %s1434_s14 }
  0x10   : > { %v280_v23 = vld [vmem:[%s2484_s8 + $0x1] sm:$0xff]  ;;  %v2149_v48 = vpack.c.bf16 %v267_v46, %v266_v45  ;;  %v255_v50 = vld [vmem:[%s2911_s1 + $0x18] sm:$0xff]  ;;  %v268_v51 = vld [vmem:[%s2912_s2 + $0x10] sm:$0xff] }
  0x11   : > { %1769 = vmatprep.mubr.msk.f32.mxu0 %vm297_vm0, %v280_v23  ;;  %1831 = vmatprep.mubr.msk.f32.mxu1 %vm297_vm0, %v280_v23  ;;  %v269_v52 = vld [vmem:[%s2912_s2 + $0x18] sm:$0xff]  ;;  %v281_v53 = vld [vmem:[%s2484_s8 + $0x9] sm:$0x3]  ;;  %v2097_v54 = vpack.c.bf16 %v255_v50, %v254_v49  ;;  %v256_v56 = vld [vmem:[%s2911_s1 + $0x20] sm:$0xff] }
  0x12   : > { %2076 = vmatpush3.bf16.msra.mxu0 %v2073_v16  ;;  %2132 = vmatpush3.bf16.msra.mxu1 %v2129_v17  ;;  %v2153_v55 = vpack.c.bf16 %v269_v52, %v268_v51  ;;  %v257_v57 = vld [vmem:[%s2911_s1 + $0x28] sm:$0xff]  ;;  %v270_v58 = vld [vmem:[%s2912_s2 + $0x20] sm:$0xff]  ;;  %v258_v63 = vld [vmem:[%s2911_s1 + $0x30] sm:$0xff] }
  0x13   : > { %2078 = vmatprep.subr.bf16.mxu0 %v2077_v22  ;;  %2134 = vmatprep.subr.bf16.mxu1 %v2133_v24  ;;  %v271_v59 = vld [vmem:[%s2912_s2 + $0x28] sm:$0xff]  ;;  %v250_v60 = vld [vmem:[%s2484_s8] sm:$0xff]  ;;  %v2101_v61 = vpack.c.bf16 %v257_v57, %v256_v56  ;;  %v259_v0 = vld [vmem:[%s2911_s1 + $0x38] sm:$0xff] }
  0x14   : > { %v2157_v62 = vpack.c.bf16 %v271_v59, %v270_v58  ;;  %v272_v1 = vld [vmem:[%s2912_s2 + $0x30] sm:$0xff]  ;;  %v273_v2 = vld [vmem:[%s2912_s2 + $0x38] sm:$0xff]  ;;  %v2105_v3 = vpack.c.bf16 %v259_v0, %v258_v63  ;;  %v260_v5 = vld [vmem:[%s2911_s1 + $0x40] sm:$0xff] }
  0x15   : > { %v2161_v4 = vpack.c.bf16 %v273_v2, %v272_v1  ;;  %v261_v6 = vld [vmem:[%s2911_s1 + $0x48] sm:$0xff]  ;;  %v274_v7 = vld [vmem:[%s2912_s2 + $0x40] sm:$0xff]  ;;  %v262_v11 = vld [vmem:[%s2911_s1 + $0x50] sm:$0xff] }
  0x16   : > { %2080 = vmatpush3.bf16.msra.mxu0 %v2077_v22  ;;  %2136 = vmatpush3.bf16.msra.mxu1 %v2133_v24  ;;  %v275_v8 = vld [vmem:[%s2912_s2 + $0x48] sm:$0xff]  ;;  %v2109_v9 = vpack.c.bf16 %v261_v6, %v260_v5  ;;  %v263_v12 = vld [vmem:[%s2911_s1 + $0x58] sm:$0xff]  ;;  %v276_v13 = vld [vmem:[%s2912_s2 + $0x50] sm:$0xff] }
  0x17   : > { %2082 = vmatprep.subr.bf16.mxu0 %v2081_v29  ;;  %2138 = vmatprep.subr.bf16.mxu1 %v2137_v30  ;;  %v2165_v10 = vpack.c.bf16 %v275_v8, %v274_v7  ;;  %v277_v14 = vld [vmem:[%s2912_s2 + $0x58] sm:$0xff]  ;;  %v2113_v15 = vpack.c.bf16 %v263_v12, %v262_v11  ;;  %v264_v17 = vld [vmem:[%s2911_s1 + $0x60] sm:$0xff]  ;;  %v265_v18 = vld [vmem:[%s2911_s1 + $0x68] sm:$0xff] }
  0x18   : > { %v2169_v16 = vpack.c.bf16 %v277_v14, %v276_v13  ;;  %v278_v19 = vld [vmem:[%s2912_s2 + $0x60] sm:$0xff]  ;;  %v279_v20 = vld [vmem:[%s2912_s2 + $0x68] sm:$0xff]  ;;  %v2117_v21 = vpack.c.bf16 %v265_v18, %v264_v17  ;;  %v1489_v31 = vld [vmem:[%s2912_s2 + $0xf0] sm:$0xff] }
  0x19   : > { %v2173_v22 = vpack.c.bf16 %v279_v20, %v278_v19  ;;  %v1471_v23 = vld [vmem:[%s2911_s1 + $0xe0] sm:$0xff]  ;;  %v1472_v24 = vld [vmem:[%s2911_s1 + $0xe8] sm:$0xff]  ;;  %v1490_v32 = vld [vmem:[%s2912_s2 + $0xf8] sm:$0xff] }
  0x1a   : > { %2084 = vmatpush3.bf16.msra.mxu0 %v2081_v29  ;;  %2140 = vmatpush3.bf16.msra.mxu1 %v2137_v30  ;;  %v1487_v25 = vld [vmem:[%s2912_s2 + $0xe0] sm:$0xff]  ;;  %v1488_v26 = vld [vmem:[%s2912_s2 + $0xe8] sm:$0xff]  ;;  %v2177_v27 = vpack.c.bf16 %v1472_v24, %v1471_v23  ;;  %v1473_v29 = vld [vmem:[%s2911_s1 + $0xf0] sm:$0xff] }
  0x1b   : > { %2086 = vmatprep.subr.bf16.mxu0 %v2085_v35  ;;  %2142 = vmatprep.subr.bf16.mxu1 %v2141_v36  ;;  %v2205_v28 = vpack.c.bf16 %v1488_v26, %v1487_v25  ;;  %v1474_v30 = vld [vmem:[%s2911_s1 + $0xf8] sm:$0xff]  ;;  %v251_v33 = vld [vmem:[%s2484_s8 + $0x8] sm:$0x3]  ;;  %v1491_v38 = vld [vmem:[%s2912_s2 + $0x100] sm:$0xff] }
  0x1c   : > { %v2181_v34 = vpack.c.bf16 %v1474_v30, %v1473_v29  ;;  %v1476_v37 = vld [vmem:[%s2911_s1 + $0x108] sm:$0xff]  ;;  %v1477_v43 = vld [vmem:[%s2911_s1 + $0x110] sm:$0xff]  ;;  %v1478_v44 = vld [vmem:[%s2911_s1 + $0x118] sm:$0xff] }
  0x1d   : > { %v1492_v39 = vld [vmem:[%s2912_s2 + $0x108] sm:$0xff]  ;;  %v1493_v45 = vld [vmem:[%s2912_s2 + $0x110] sm:$0xff]  ;;  %v1494_v46 = vld [vmem:[%s2912_s2 + $0x118] sm:$0xff] }
  0x1e   : > { %2088 = vmatpush3.bf16.msra.mxu0 %v2085_v35  ;;  %2144 = vmatpush3.bf16.msra.mxu1 %v2141_v36  ;;  %v2209_v35 = vpack.c.bf16 %v1490_v32, %v1489_v31  ;;  %v1475_v36 = vld [vmem:[%s2911_s1 + $0x100] sm:$0xff]  ;;  %v1480_v50 = vld [vmem:[%s2911_s1 + $0x128] sm:$0xff]  ;;  %v1482_v56 = vld [vmem:[%s2911_s1 + $0x138] sm:$0xff] }
  0x1f   : > { %2090 = vmatprep.subr.bf16.mxu0 %v2089_v41  ;;  %2146 = vmatprep.subr.bf16.mxu1 %v2145_v42  ;;  %v625_v40 = vld [vmem:[%s2484_s8 + $0x2] sm:$0xff]  ;;  %v1497_v57 = vld [vmem:[%s2912_s2 + $0x130] sm:$0xff]  ;;  %v1498_v58 = vld [vmem:[%s2912_s2 + $0x138] sm:$0xff] }
  0x20   : > { %v1479_v49 = vld [vmem:[%s2911_s1 + $0x120] sm:$0xff]  ;;  %v1496_v52 = vld [vmem:[%s2912_s2 + $0x128] sm:$0xff]  ;;  %v1519_v5 = vld [vmem:[%s2912_s2 + $0x150] sm:$0xff] }
  0x21   : > { %v1495_v51 = vld [vmem:[%s2912_s2 + $0x120] sm:$0xff]  ;;  %v1500_v0 = vld [vmem:[%s2912_s2 + $0x148] sm:$0xff]  ;;  %v1520_v6 = vld [vmem:[%s2912_s2 + $0x158] sm:$0xff] }
  0x22   : > { %2092 = vmatpush3.bf16.msra.mxu0 %v2089_v41  ;;  %2148 = vmatpush3.bf16.msra.mxu1 %v2145_v42  ;;  %v2185_v41 = vpack.c.bf16 %v1476_v37, %v1475_v36  ;;  %v2213_v42 = vpack.c.bf16 %v1492_v39, %v1491_v38  ;;  %v1499_v63 = vld [vmem:[%s2912_s2 + $0x140] sm:$0xff]  ;;  %v2261_v8 = vpack.c.bf16 %v1520_v6, %v1519_v5  ;;  %v1522_v12 = vld [vmem:[%s2912_s2 + $0x168] sm:$0xff]  ;;  %v1508_v17 = vld [vmem:[%s2911_s1 + $0x178] sm:$0xff] }
  0x23   : > { %2094 = vmatprep.subr.bf16.mxu0 %v2093_v47  ;;  %2150 = vmatprep.subr.bf16.mxu1 %v2149_v48  ;;  %v2229_v2 = vpack.c.bf16 %v1500_v0, %v1499_v63  ;;  %v1521_v11 = vld [vmem:[%s2912_s2 + $0x160] sm:$0xff]  ;;  %v626_v13 = vld [vmem:[%s2484_s8 + $0xa] sm:$0x3]  ;;  %v1523_v18 = vld [vmem:[%s2912_s2 + $0x170] sm:$0xff] }
  0x24   : > { %v1524_v19 = vld [vmem:[%s2912_s2 + $0x178] sm:$0xff]  ;;  %v817_v20 = vld [vmem:[%s2484_s8 + $0x3] sm:$0xff]  ;;  %v1511_v29 = vld [vmem:[%s2911_s1 + $0x190] sm:$0xff] }
  0x25   : > { %1770 = vmatmul.mubr.msk.f32.vlgmr.msra.gmra.mrb[0].mxu0 %vm297_vm0, %v281_v53  ;;  %1832 = vmatmul.mubr.msk.f32.vlgmr.msra.gmra.mrb[0].mxu1 %vm297_vm0, %v281_v53  ;;  %v2193_v53 = vpack.c.bf16 %v1480_v50, %v1479_v49  ;;  %v1509_v23 = vld [vmem:[%s2911_s1 + $0x180] sm:$0xff]  ;;  %v1510_v24 = vld [vmem:[%s2911_s1 + $0x188] sm:$0xff]  ;;  %v1512_v30 = vld [vmem:[%s2911_s1 + $0x198] sm:$0xff] }
  0x26   : > { %2096 = vmatpush3.bf16.msra.mxu0 %v2093_v47  ;;  %2152 = vmatpush3.bf16.msra.mxu1 %v2149_v48  ;;  %v2189_v47 = vpack.c.bf16 %v1478_v44, %v1477_v43  ;;  %v2217_v48 = vpack.c.bf16 %v1494_v46, %v1493_v45  ;;  %v1525_v25 = vld [vmem:[%s2912_s2 + $0x180] sm:$0xff]  ;;  %v1526_v26 = vld [vmem:[%s2912_s2 + $0x188] sm:$0xff]  ;;  %v1527_v31 = vld [vmem:[%s2912_s2 + $0x190] sm:$0xff] }
  0x27   : > { %2098 = vmatprep.subr.bf16.mxu0 %v2097_v54  ;;  %2154 = vmatprep.subr.bf16.mxu1 %v2153_v55  ;;  %v1528_v32 = vld [vmem:[%s2912_s2 + $0x198] sm:$0xff]  ;;  %v1514_v36 = vld [vmem:[%s2911_s1 + $0x1a8] sm:$0xff]  ;;  %v1529_v37 = vld [vmem:[%s2912_s2 + $0x1a0] sm:$0xff] }
  0x28   : > { %1800 = vmatprep.mubr.msk.f32.mxu0 %vm297_vm0, %v250_v60  ;;  %1862 = vmatprep.mubr.msk.f32.mxu1 %vm297_vm0, %v250_v60  ;;  %v2225_v60 = vpack.c.bf16 %v1498_v58, %v1497_v57  ;;  %v1530_v38 = vld [vmem:[%s2912_s2 + $0x1a8] sm:$0xff]  ;;  %v1531_v43 = vld [vmem:[%s2912_s2 + $0x1b0] sm:$0xff]  ;;  %v1532_v44 = vld [vmem:[%s2912_s2 + $0x1b8] sm:$0xff] }
  0x29   : > { %v2285_v46 = vpack.c.bf16 %v1532_v44, %v1531_v43  ;;  %v1551_v49 = vld [vmem:[%s2912_s2 + $0x1c0] sm:$0xff]  ;;  %v1552_v50 = vld [vmem:[%s2912_s2 + $0x1c8] sm:$0xff]  ;;  %v1557_v5 = vld [vmem:[%s2912_s2 + $0x1f0] sm:$0xff] }
  0x2a   : > { %2100 = vmatpush3.bf16.msra.mxu0 %v2097_v54  ;;  %2156 = vmatpush3.bf16.msra.mxu1 %v2153_v55  ;;  %v2221_v54 = vpack.c.bf16 %v1496_v52, %v1495_v51  ;;  %v1481_v55 = vld [vmem:[%s2911_s1 + $0x130] sm:$0xff]  ;;  %v2317_v52 = vpack.c.bf16 %v1552_v50, %v1551_v49  ;;  %v818_v57 = vld [vmem:[%s2484_s8 + $0xb] sm:$0x3]  ;;  %v1558_v6 = vld [vmem:[%s2912_s2 + $0x1f8] sm:$0xff] }
  0x2b   : > { %2102 = vmatprep.subr.bf16.mxu0 %v2101_v61  ;;  %2158 = vmatprep.subr.bf16.mxu1 %v2157_v62  ;;  %v2197_v59 = vpack.c.bf16 %v1482_v56, %v1481_v55  ;;  %v1553_v55 = vld [vmem:[%s2912_s2 + $0x1d0] sm:$0xff]  ;;  %v1554_v56 = vld [vmem:[%s2912_s2 + $0x1d8] sm:$0xff]  ;;  %v1556_v63 = vld [vmem:[%s2912_s2 + $0x1e8] sm:$0xff] }
  0x2c   : > { %v1009_v0 = vld [vmem:[%s2484_s8 + $0x4] sm:$0xff]  ;;  %vm2347_vm4 = vmpackc.low %vm1223_vm2, %vm2392_vm3 }
  0x2e   : > { %2104 = vmatpush3.bf16.msra.mxu0 %v2101_v61  ;;  %2160 = vmatpush3.bf16.msra.mxu1 %v2157_v62  ;;  %v1483_v61 = vld [vmem:[%s2911_s1 + $0x140] sm:$0xff]  ;;  %v1484_v62 = vld [vmem:[%s2911_s1 + $0x148] sm:$0xff] }
  0x2f   : > { %2106 = vmatprep.subr.bf16.mxu0 %v2105_v3  ;;  %2162 = vmatprep.subr.bf16.mxu1 %v2161_v4  ;;  %v2201_v1 = vpack.c.bf16 %v1484_v62, %v1483_v61  ;;  %v1540_v61 = vld [vmem:[%s2911_s1 + $0x1e8] sm:$0xff]  ;;  %v1555_v62 = vld [vmem:[%s2912_s2 + $0x1e0] sm:$0xff] }
  0x32   : > { %2108 = vmatpush3.bf16.msra.mxu0 %v2105_v3  ;;  %2164 = vmatpush3.bf16.msra.mxu1 %v2161_v4  ;;  %v1503_v3 = vld [vmem:[%s2911_s1 + $0x150] sm:$0xff]  ;;  %v1504_v4 = vld [vmem:[%s2911_s1 + $0x158] sm:$0xff] }
  0x33   : > { %2110 = vmatprep.subr.bf16.mxu0 %v2109_v9  ;;  %2166 = vmatprep.subr.bf16.mxu1 %v2165_v10  ;;  %v2233_v7 = vpack.c.bf16 %v1504_v4, %v1503_v3  ;;  %v1541_v3 = vld [vmem:[%s2911_s1 + $0x1f0] sm:$0xff]  ;;  %v1542_v4 = vld [vmem:[%s2911_s1 + $0x1f8] sm:$0xff] }
  0x36   : > { %2112 = vmatpush3.bf16.msra.mxu0 %v2109_v9  ;;  %2168 = vmatpush3.bf16.msra.mxu1 %v2165_v10  ;;  %v1505_v9 = vld [vmem:[%s2911_s1 + $0x160] sm:$0xff]  ;;  %v1506_v10 = vld [vmem:[%s2911_s1 + $0x168] sm:$0xff] }
  0x37   : > { %2114 = vmatprep.subr.bf16.mxu0 %v2113_v15  ;;  %2170 = vmatprep.subr.bf16.mxu1 %v2169_v16  ;;  %v2237_v14 = vpack.c.bf16 %v1506_v10, %v1505_v9  ;;  %v1543_v9 = vld [vmem:[%s2911_s1 + $0x200] sm:$0xff]  ;;  %v1544_v10 = vld [vmem:[%s2911_s1 + $0x208] sm:$0xff] }
  0x3a   : > { %2116 = vmatpush3.bf16.msra.mxu0 %v2113_v15  ;;  %2172 = vmatpush3.bf16.msra.mxu1 %v2169_v16  ;;  %v2265_v15 = vpack.c.bf16 %v1522_v12, %v1521_v11  ;;  %v1507_v16 = vld [vmem:[%s2911_s1 + $0x170] sm:$0xff]  ;;  %v1559_v11 = vld [vmem:[%s2912_s2 + $0x200] sm:$0xff]  ;;  %v1560_v12 = vld [vmem:[%s2912_s2 + $0x208] sm:$0xff] }
  0x3b   : > { %2118 = vmatprep.subr.bf16.mxu0 %v2117_v21  ;;  %2174 = vmatprep.subr.bf16.mxu1 %v2173_v22 }
  0x3e   : > { %2120 = vmatpush3.bf16.msra.mxu0 %v2117_v21  ;;  %2176 = vmatpush3.bf16.msra.mxu1 %v2173_v22  ;;  %v2241_v21 = vpack.c.bf16 %v1508_v17, %v1507_v16  ;;  %v2269_v22 = vpack.c.bf16 %v1524_v19, %v1523_v18  ;;  %v1546_v16 = vld [vmem:[%s2911_s1 + $0x218] sm:$0xff]  ;;  %v1561_v17 = vld [vmem:[%s2912_s2 + $0x210] sm:$0xff] }
  0x3f   : > { %2178 = vmatprep.subr.bf16.mxu0 %v2177_v27  ;;  %2206 = vmatprep.subr.bf16.mxu1 %v2205_v28  ;;  %v1562_v18 = vld [vmem:[%s2912_s2 + $0x218] sm:$0xff] }
  0x41   : > { %1801 = vmatmul.mubr.msk.f32.vlgmr.msra.gmra.mrb[0].mxu0 %vm297_vm0, %v251_v33  ;;  %1863 = vmatmul.mubr.msk.f32.vlgmr.msra.gmra.mrb[0].mxu1 %vm297_vm0, %v251_v33  ;;  %v2249_v33 = vpack.c.bf16 %v1512_v30, %v1511_v29  ;;  %v2391_v29 = vmov 0.0   ;;  %v1567_v30 = vld [vmem:[%s2913_s3] ss:$0 sm:$0xff] }
  0x42   : > { %2180 = vmatpush3.bf16.msra.mxu0 %v2177_v27  ;;  %2208 = vmatpush3.bf16.msra.mxu1 %v2205_v28  ;;  %v2245_v27 = vpack.c.bf16 %v1510_v24, %v1509_v23  ;;  %v2273_v28 = vpack.c.bf16 %v1526_v26, %v1525_v25  ;;  %v1563_v23 = vld [vmem:[%s2912_s2 + $0x220] sm:$0xff]  ;;  %v1564_v24 = vld [vmem:[%s2912_s2 + $0x228] sm:$0xff] }
  0x43   : > { %2182 = vmatprep.subr.bf16.mxu0 %v2181_v34  ;;  %2210 = vmatprep.subr.bf16.mxu1 %v2209_v35  ;;  %v2341_v26 = vpack.c.bf16 %v1564_v24, %v1563_v23 }
  0x44   : > { %1893 = vmatprep.mubr.msk.f32.mxu0 %vm297_vm0, %v625_v40  ;;  %1924 = vmatprep.mubr.msk.f32.mxu1 %vm297_vm0, %v625_v40  ;;  %v2281_v40 = vpack.c.bf16 %v1530_v38, %v1529_v37 }
  0x46   : > { %2184 = vmatpush3.bf16.msra.mxu0 %v2181_v34  ;;  %2212 = vmatpush3.bf16.msra.mxu1 %v2209_v35  ;;  %v2277_v34 = vpack.c.bf16 %v1528_v32, %v1527_v31  ;;  %v1513_v35 = vld [vmem:[%s2911_s1 + $0x1a0] sm:$0xff] }
  0x47   : > { %2186 = vmatprep.subr.bf16.mxu0 %v2185_v41  ;;  %2214 = vmatprep.subr.bf16.mxu1 %v2213_v42  ;;  %v2253_v39 = vpack.c.bf16 %v1514_v36, %v1513_v35 }
  0x4a   : > { %2188 = vmatpush3.bf16.msra.mxu0 %v2185_v41  ;;  %2216 = vmatpush3.bf16.msra.mxu1 %v2213_v42  ;;  %v1515_v41 = vld [vmem:[%s2911_s1 + $0x1b0] sm:$0xff]  ;;  %v1516_v42 = vld [vmem:[%s2911_s1 + $0x1b8] sm:$0xff] }
  0x4b   : > { %2190 = vmatprep.subr.bf16.mxu0 %v2189_v47  ;;  %2218 = vmatprep.subr.bf16.mxu1 %v2217_v48  ;;  %v2257_v45 = vpack.c.bf16 %v1516_v42, %v1515_v41 }
  0x4e   : > { %2192 = vmatpush3.bf16.msra.mxu0 %v2189_v47  ;;  %2220 = vmatpush3.bf16.msra.mxu1 %v2217_v48  ;;  %v1535_v47 = vld [vmem:[%s2911_s1 + $0x1c0] sm:$0xff]  ;;  %v1536_v48 = vld [vmem:[%s2911_s1 + $0x1c8] sm:$0xff] }
  0x4f   : > { %2194 = vmatprep.subr.bf16.mxu0 %v2193_v53  ;;  %2222 = vmatprep.subr.bf16.mxu1 %v2221_v54  ;;  %v2289_v51 = vpack.c.bf16 %v1536_v48, %v1535_v47  ;;  %v1297_v47 = vld [vmem:[%s2915_s5] sm:$0x1f] }
  0x52   : > { %2196 = vmatpush3.bf16.msra.mxu0 %v2193_v53  ;;  %2224 = vmatpush3.bf16.msra.mxu1 %v2221_v54  ;;  %v1537_v53 = vld [vmem:[%s2911_s1 + $0x1d0] sm:$0xff]  ;;  %v1538_v54 = vld [vmem:[%s2911_s1 + $0x1d8] sm:$0xff] }
  0x53   : > { %2198 = vmatprep.subr.bf16.mxu0 %v2197_v59  ;;  %2226 = vmatprep.subr.bf16.mxu1 %v2225_v60  ;;  %v2293_v58 = vpack.c.bf16 %v1538_v54, %v1537_v53 }
  0x56   : > { %2200 = vmatpush3.bf16.msra.mxu0 %v2197_v59  ;;  %2228 = vmatpush3.bf16.msra.mxu1 %v2225_v60  ;;  %v2321_v59 = vpack.c.bf16 %v1554_v56, %v1553_v55  ;;  %v1539_v60 = vld [vmem:[%s2911_s1 + $0x1e0] sm:$0xff] }
  0x57   : > { %2202 = vmatprep.subr.bf16.mxu0 %v2201_v1  ;;  %2230 = vmatprep.subr.bf16.mxu1 %v2229_v2 }
  0x5a   : > { %2204 = vmatpush3.bf16.msra.mxu0 %v2201_v1  ;;  %2232 = vmatpush3.bf16.msra.mxu1 %v2229_v2  ;;  %v2297_v1 = vpack.c.bf16 %v1540_v61, %v1539_v60  ;;  %v2325_v2 = vpack.c.bf16 %v1556_v63, %v1555_v62 }
  0x5b   : > { %2234 = vmatprep.subr.bf16.mxu0 %v2233_v7  ;;  %2262 = vmatprep.subr.bf16.mxu1 %v2261_v8 }
  0x5d   : > { %1894 = vmatmul.mubr.msk.f32.vlgmr.msra.gmra.mrb[0].mxu0 %vm297_vm0, %v626_v13  ;;  %1925 = vmatmul.mubr.msk.f32.vlgmr.msra.gmra.mrb[0].mxu1 %vm297_vm0, %v626_v13  ;;  %v2305_v13 = vpack.c.bf16 %v1544_v10, %v1543_v9 }
  0x5e   : > { %2236 = vmatpush3.bf16.msra.mxu0 %v2233_v7  ;;  %2264 = vmatpush3.bf16.msra.mxu1 %v2261_v8  ;;  %v2301_v7 = vpack.c.bf16 %v1542_v4, %v1541_v3  ;;  %v2329_v8 = vpack.c.bf16 %v1558_v6, %v1557_v5 }
  0x5f   : > { %2238 = vmatprep.subr.bf16.mxu0 %v2237_v14  ;;  %2266 = vmatprep.subr.bf16.mxu1 %v2265_v15 }
  0x60   : > { %1955 = vmatprep.mubr.msk.f32.mxu0 %vm297_vm0, %v817_v20  ;;  %1986 = vmatprep.mubr.msk.f32.mxu1 %vm297_vm0, %v817_v20  ;;  %v2337_v20 = vpack.c.bf16 %v1562_v18, %v1561_v17 }
  0x62   : > { %2240 = vmatpush3.bf16.msra.mxu0 %v2237_v14  ;;  %2268 = vmatpush3.bf16.msra.mxu1 %v2265_v15  ;;  %v2333_v14 = vpack.c.bf16 %v1560_v12, %v1559_v11  ;;  %v1545_v15 = vld [vmem:[%s2911_s1 + $0x210] sm:$0xff] }
  0x63   : > { %2242 = vmatprep.subr.bf16.mxu0 %v2241_v21  ;;  %2270 = vmatprep.subr.bf16.mxu1 %v2269_v22  ;;  %v2309_v19 = vpack.c.bf16 %v1546_v16, %v1545_v15 }
  0x66   : > { %2244 = vmatpush3.bf16.msra.mxu0 %v2241_v21  ;;  %2272 = vmatpush3.bf16.msra.mxu1 %v2269_v22  ;;  %v1547_v21 = vld [vmem:[%s2911_s1 + $0x220] sm:$0xff]  ;;  %v1548_v22 = vld [vmem:[%s2911_s1 + $0x228] sm:$0xff] }
  0x67   : > { %2246 = vmatprep.subr.bf16.mxu0 %v2245_v27  ;;  %2274 = vmatprep.subr.bf16.mxu1 %v2273_v28  ;;  %v2313_v25 = vpack.c.bf16 %v1548_v22, %v1547_v21 }
  0x6a   : > { %2248 = vmatpush3.bf16.msra.mxu0 %v2245_v27  ;;  %2276 = vmatpush3.bf16.msra.mxu1 %v2273_v28  ;;  %v1010_v27 = vld [vmem:[%s2484_s8 + $0xc] sm:$0x3]  ;;  %v2389_v28 = vmov 0.0|0.0  }
  0x6b   : > { %2250 = vmatprep.subr.bf16.mxu0 %v2249_v33  ;;  %2278 = vmatprep.subr.bf16.mxu1 %v2277_v34 }
  0x6e   : > { %2252 = vmatpush3.bf16.msra.mxu0 %v2249_v33  ;;  %2280 = vmatpush3.bf16.msra.mxu1 %v2277_v34 }
  0x6f   : > { %2254 = vmatprep.subr.bf16.mxu0 %v2253_v39  ;;  %2282 = vmatprep.subr.bf16.mxu1 %v2281_v40 }
  0x72   : > { %2256 = vmatpush3.bf16.msra.mxu0 %v2253_v39  ;;  %2284 = vmatpush3.bf16.msra.mxu1 %v2281_v40 }
  0x73   : > { %2258 = vmatprep.subr.bf16.mxu0 %v2257_v45  ;;  %2286 = vmatprep.subr.bf16.mxu1 %v2285_v46 }
  0x76   : > { %2260 = vmatpush3.bf16.msra.mxu0 %v2257_v45  ;;  %2288 = vmatpush3.bf16.msra.mxu1 %v2285_v46  ;;  %v1218_v46 = vld [vmem:[%s2914_s4] sm:$0x1f] }
  0x77   : > { %2290 = vmatprep.subr.bf16.mxu0 %v2289_v51  ;;  %2318 = vmatprep.subr.bf16.mxu1 %v2317_v52 }
  0x79   : > { %1956 = vmatmul.mubr.msk.f32.vlgmr.msra.gmra.mrb[0].mxu0 %vm297_vm0, %v818_v57  ;;  %1987 = vmatmul.mubr.msk.f32.vlgmr.msra.gmra.mrb[0].mxu1 %vm297_vm0, %v818_v57 }
  0x7a   : > { %2292 = vmatpush3.bf16.msra.mxu0 %v2289_v51  ;;  %2320 = vmatpush3.bf16.msra.mxu1 %v2317_v52 }
  0x7b   : > { %2294 = vmatprep.subr.bf16.mxu0 %v2293_v58  ;;  %2322 = vmatprep.subr.bf16.mxu1 %v2321_v59 }
  0x7c   : > { %2017 = vmatprep.mubr.msk.f32.mxu0 %vm297_vm0, %v1009_v0  ;;  %2048 = vmatprep.mubr.msk.f32.mxu1 %vm297_vm0, %v1009_v0 }
  0x7e   : > { %2296 = vmatpush3.bf16.msra.mxu0 %v2293_v58  ;;  %2324 = vmatpush3.bf16.msra.mxu1 %v2321_v59 }
  0x7f   : > { %2298 = vmatprep.subr.bf16.mxu0 %v2297_v1  ;;  %2326 = vmatprep.subr.bf16.mxu1 %v2325_v2 }
  0x82   : > { %2300 = vmatpush3.bf16.msra.mxu0 %v2297_v1  ;;  %2328 = vmatpush3.bf16.msra.mxu1 %v2325_v2 }
  0x83   : > { %2302 = vmatprep.subr.bf16.mxu0 %v2301_v7  ;;  %2330 = vmatprep.subr.bf16.mxu1 %v2329_v8 }
  0x86   : > { %2304 = vmatpush3.bf16.msra.mxu0 %v2301_v7  ;;  %2332 = vmatpush3.bf16.msra.mxu1 %v2329_v8 }
  0x87   : > { %2306 = vmatprep.subr.bf16.mxu0 %v2305_v13  ;;  %2334 = vmatprep.subr.bf16.mxu1 %v2333_v14 }
  0x8a   : > { %2308 = vmatpush3.bf16.msra.mxu0 %v2305_v13  ;;  %2336 = vmatpush3.bf16.msra.mxu1 %v2333_v14 }
  0x8b   : > { %2310 = vmatprep.subr.bf16.mxu0 %v2309_v19  ;;  %2338 = vmatprep.subr.bf16.mxu1 %v2337_v20 }
  0x8e   : > { %2312 = vmatpush3.bf16.msra.mxu0 %v2309_v19  ;;  %2340 = vmatpush3.bf16.msra.mxu1 %v2337_v20 }
  0x8f   : > { %2314 = vmatprep.subr.bf16.mxu0 %v2313_v25  ;;  %2342 = vmatprep.subr.bf16.mxu1 %v2341_v26 }
  0x92   : > { %2316 = vmatpush3.bf16.msra.mxu0 %v2313_v25  ;;  %2344 = vmatpush3.bf16.msra.mxu1 %v2341_v26 }
  0x93   : > { %2345 = vmatprep.subr.bf16.mxu0 %v2389_v28  ;;  %2349 = vmatprep.subr.bf16.mxu1 %v2389_v28 }
  0x95   : > { %2018 = vmatmul.mubr.msk.f32.vlgmr.msra.gmra.mrb[0].mxu0 %vm297_vm0, %v1010_v27  ;;  %2049 = vmatmul.mubr.msk.f32.vlgmr.msra.gmra.mrb[0].mxu1 %vm297_vm0, %v1010_v27 }
  0x96   : > { %2055 = vmatprep.mubr.msk.f32.mxu0 %vm2390_vm1, %v2391_v29  ;;  %2062 = vmatprep.mubr.msk.f32.mxu1 %vm2390_vm1, %v2391_v29 }
 0x168   : > { %v2019_v31 = vpop.f32.mrb[0].mxu0  ;;  %v2050_v33 = vpop.f32.mrb[0].mxu1 }
 0x169   : > { %v1209_v32 = vadd.f32 %v2019_v31, %v1567_v30  ;;  %v1098_v34 = vpop.f32.mrb[1].mxu0  ;;  %v1213_v35 = vadd.f32 %v2050_v33, %v1567_v30  ;;  %v1190_v37 = vpop.f32.mrb[1].mxu1 }
 0x16a   : > { %v1208_v36 = vadd.f32 %v1567_v30, %v1098_v34  ;;  %v1212_v39 = vadd.f32 %v1567_v30, %v1190_v37 }
 0x16b   : > { %v1211_v38 = vmax.f32 %v1209_v32, 0.0  ;;  %v1215_v40 = vmax.f32 %v1213_v35, 0.0 }
 0x16c   : > { %v1210_v41 = vmax.f32 %v1208_v36, 0.0  ;;  %v1214_v42 = vmax.f32 %v1212_v39, 0.0 }
 0x16d   : > { %v1217_v43 = vmax.f32 %v1211_v38, %v1215_v40 }
 0x16e   : > { %v1216_v44 = vmax.f32 %v1210_v41, %v1214_v42 }
 0x170   : > { %v2346_v45 = vpack.c.bf16 %v1217_v43, %v1216_v44 }
 0x172   : > { %2348 = vmatpush3.bf16.msk.msra.mxu0 %vm2347_vm4, %v2346_v45  ;;  %2352 = vmatpush3.bf16.msk.msra.mxu1 %vm2347_vm4, %v2346_v45 }
 0x175   : > { %2056 = vmatmul.mubr.msk.f32.vlgmr.msra.gmra.mrb[2].mxu0 %vm1219_vm5, %v1218_v46  ;;  %2063 = vmatmul.mubr.msk.f32.vlgmr.msra.gmra.mrb[2].mxu1 %vm1219_vm5, %v1297_v47 }
 0x248   : > { %v1293_v48 = vpop.f32.mrb[2].mxu0  ;;  %v1367_v49 = vpop.f32.mrb[2].mxu1 }
 0x249   : > { %v1371_v50 = vmax.f32 %v1293_v48, %v1367_v49  ;;  %v2057_v51 = vpop.f32.mrb[3].mxu0  ;;  %v2064_v52 = vpop.f32.mrb[3].mxu1 }
 0x24b   : > { %1373 = vst.msk [vmem:[%s249_s17] sm:$0x1f] %vm1372_vm6, %v1371_v50 }
 0x24c PF: > { %s16_s21 = sadd.s32 1, %s2387_s21  }
 0x24d   : > { %p13_p4 = scmp.ge.s32.totalorder %s16_s21, 4  }
 0x24f   :  { %15 = sbr.rel (!%p13_p4) target bundleno = 1 (0x1), region = 82 }

</bundles_post_ra>
